<compile_context>
chip_gen: v7x
topology: tpu7x:2x2x1
jax: 0.10.0
libtpu: 0.0.40
codegen_flags: <defaults>
</compile_context>

<pallas_src>
import functools

import jax
import jax.numpy as jnp
from jax.experimental import pallas as pl
from jax.experimental.pallas import tpu as pltpu

LANE = 128
SUBLANE = 8
# 32 MiB scoped VMEM is ample for the default tiles (actual usage is a few MiB).
# v6e: may be raised to 64-96 MiB when pushing tm/tk to 512/1024.
# v7x: budget against the 64 MiB physical part (keep total usage <= ~48 MiB):
#   2*(tm*tk*adj_bytes) [adj dbl-buf] + N_c*Ch_p*cbytes [resident z] + tm*Ch_p*4 [f32 acc]
#   + 2*(tm*Ch_p*out_bytes) [out dbl-buf] + small.
VMEM_LIMIT_BYTES = 32 * 1024 * 1024


def _round_up(x, m):
    return ((x + m - 1) // m) * m


def _pad2(a, rows, cols, dtype=None):
    a = jnp.pad(a, ((0, rows - a.shape[0]), (0, cols - a.shape[1])))
    return a.astype(dtype) if dtype is not None else a


def _as_compute(a, compute_dtype):
    """Cast a streamed operand to the MXU compute dtype (int storage -> f32 -> compute)."""
    if a.dtype == compute_dtype:
        return a
    if not jnp.issubdtype(a.dtype, jnp.floating):
        a = a.astype(jnp.float32)        # int8 edge counts -> f32 (exact), then to compute dtype
    return a.astype(compute_dtype)


# ---------------------------------------------------------------------------
# Kernel 1: first GCN propagation.
#   h1[i] = relu((sum_k A[i,k] @ z1[k]) * inv_deg[i]),   z1 = x W1 + b1 (resident in VMEM)
# Grid = (row tiles, k tiles); f32 accumulator; 1/deg applied on the f32 accumulator at finalize.
# ---------------------------------------------------------------------------
def gcn_layer1_kernel(adj_ref, z1_ref, inv_deg_ref, h1_ref, acc_ref, *, tk, compute_dtype):
    k = pl.program_id(1)

    @pl.when(k == 0)
    def _init():
        acc_ref[...] = jnp.zeros_like(acc_ref)

    a = _as_compute(adj_ref[...], compute_dtype)
    k0 = pl.multiple_of(k * tk, tk)
    acc_ref[...] += jnp.dot(a, z1_ref[pl.ds(k0, tk), :],
                            preferred_element_type=jnp.float32)

    @pl.when(k == pl.num_programs(1) - 1)
    def _finalize():
        h = acc_ref[...] * inv_deg_ref[...]        # per-row 1/deg, f32
        h1_ref[...] = jnp.maximum(h, 0.0).astype(h1_ref.dtype)


# ---------------------------------------------------------------------------
# Kernel 2: second GCN propagation with the mean-pool folded into the finalize.
#   g = P @ ((A @ z2) / deg) = (P * (1/deg)^T) @ (A @ z2)
#   partial[i] = (P*(1/deg))[:, i-tile] @ (sum_k A[i,k] @ z2[k])      (second output, summed in XLA)
# Keeping the row axis "parallel" (per-tile partials instead of an in-kernel cross-row accumulator)
# lets a v7x megacore shard the row tiles.
# ---------------------------------------------------------------------------
def gcn_layer2_pool_kernel(adj_ref, z2_ref, pool_ref, part_ref, acc_ref, *, tk, compute_dtype):
    k = pl.program_id(1)

    @pl.when(k == 0)
    def _init():
        acc_ref[...] = jnp.zeros_like(acc_ref)

    a = _as_compute(adj_ref[...], compute_dtype)
    k0 = pl.multiple_of(k * tk, tk)
    acc_ref[...] += jnp.dot(a, z2_ref[pl.ds(k0, tk), :],
                            preferred_element_type=jnp.float32)

    @pl.when(k == pl.num_programs(1) - 1)
    def _finalize():
        part_ref[0] = jnp.dot(pool_ref[...], acc_ref[...],
                              preferred_element_type=jnp.float32)


def graph_gnn_forward(x, edge_index, batch_idx, params, num_graphs, *,
                      tm=256, tk=512,
                      compute_dtype=jnp.bfloat16,
                      adj_dtype=None):
    """x: [N, c_in] f32, edge_index: [2, E] i32, batch_idx: [N] i32 -> [num_graphs, c_out] f32.

    (tm, tk) tiles the dense adjacency; tm >= 256 keeps the 256-wide MXU fed and, for v7x,
    keep N_r//tm >= 2 so both TensorCores get row tiles.  adj_dtype is the HBM streaming dtype
    for the raw edge counts: int8 halves the dominant stream on v5e/v6e; on v7x prefer
    bfloat16 (or fp8-e4m3) since there is no integer MXU path; the kernel casts to
    compute_dtype before the matmul either way.
    """
    w1, b1, w2, b2, wh, bh = params
    N, _ = x.shape
    c_hidden = w1.shape[1]
    if adj_dtype is None:
        adj_dtype = compute_dtype
    assert tm % SUBLANE == 0 and tk % LANE == 0

    N_r = _round_up(N, tm)                # adjacency rows (padded independently of columns)
    N_c = _round_up(N, tk)                # adjacency cols
    Ch_p = _round_up(c_hidden, LANE)
    B_p = _round_up(num_graphs, SUBLANE)

    src, dst = edge_index[0], edge_index[1]

    # Dense adjacency built ONCE, directly at padded shape and streaming dtype
    # (to_dense_adj semantics: duplicate edges accumulate).  No normalize / cast / pad passes.
    adj_p = jnp.zeros((N_r, N_c), adj_dtype).at[src, dst].add(1)

    # Row degrees straight from the edge list (no O(N^2) reduction); guard isolated nodes.
    deg = jnp.zeros((N,), jnp.float32).at[src].add(1.0)
    inv_deg = 1.0 / jnp.maximum(deg, 1.0)
    inv_deg_p = _pad2(inv_deg[:, None], N_r, 1)                       # f32

    # Layer-1 projection (tiny) stays in XLA / f32; the propagation operand is cast once and
    # kept fully VMEM-resident inside the kernel.
    z1 = x.astype(jnp.float32) @ w1 + b1
    z1_p = _pad2(z1, N_c, Ch_p, compute_dtype)

    grid = (N_r // tm, N_c // tk)

    h1 = pl.pallas_call(
        functools.partial(gcn_layer1_kernel, tk=tk, compute_dtype=compute_dtype),
        out_shape=jax.ShapeDtypeStruct((N_r, Ch_p), compute_dtype),
        grid_spec=pltpu.PrefetchScalarGridSpec(
            num_scalar_prefetch=0,
            grid=grid,
            in_specs=[
                pl.BlockSpec((tm, tk), lambda i, k: (i, k)),          # adjacency stream (dominant)
                pl.BlockSpec((N_c, Ch_p), lambda i, k: (0, 0)),       # z1 resident (fetched once)
                pl.BlockSpec((tm, 1), lambda i, k: (i, 0)),           # 1/deg per row tile (f32)
            ],
            out_specs=pl.BlockSpec((tm, Ch_p), lambda i, k: (i, 0)),  # h1 row tile (lane-dense)
            scratch_shapes=[pltpu.VMEM((tm, Ch_p), jnp.float32)],
        ),
        compiler_params=pltpu.CompilerParams(
            dimension_semantics=("parallel", "arbitrary"),
            vmem_limit_bytes=VMEM_LIMIT_BYTES),
    )(adj_p, z1_p, inv_deg_p)

    # Layer-2 projection (tiny) in XLA / f32; operand resident again.
    z2 = h1[:N, :c_hidden].astype(jnp.float32) @ w2 + b2
    z2_p = _pad2(z2, N_c, Ch_p, compute_dtype)

    # Mean-pool matrix with 1/deg folded into its columns (f32, tiny [B, N] stream).
    onehot = (batch_idx[None, :] == jnp.arange(num_graphs)[:, None]).astype(jnp.float32)
    counts = jnp.maximum(jnp.sum(onehot, axis=1, keepdims=True), 1.0)
    pool_scaled = (onehot / counts) * inv_deg[None, :]
    pool_scaled_p = _pad2(pool_scaled, B_p, N_r)

    n_row_tiles = N_r // tm
    partials = pl.pallas_call(
        functools.partial(gcn_layer2_pool_kernel, tk=tk, compute_dtype=compute_dtype),
        out_shape=jax.ShapeDtypeStruct((n_row_tiles, B_p, Ch_p), jnp.float32),
        grid_spec=pltpu.PrefetchScalarGridSpec(
            num_scalar_prefetch=0,
            grid=grid,
            in_specs=[
                pl.BlockSpec((tm, tk), lambda i, k: (i, k)),          # adjacency stream (2nd pass)
                pl.BlockSpec((N_c, Ch_p), lambda i, k: (0, 0)),       # z2 resident
                pl.BlockSpec((B_p, tm), lambda i, k: (0, i)),         # (P * 1/deg)[:, row tile]
            ],
            out_specs=pl.BlockSpec((1, B_p, Ch_p), lambda i, k: (i, 0, 0)),
            scratch_shapes=[pltpu.VMEM((tm, Ch_p), jnp.float32)],
        ),
        compiler_params=pltpu.CompilerParams(
            dimension_semantics=("parallel", "arbitrary"),
            vmem_limit_bytes=VMEM_LIMIT_BYTES),
    )(adj_p, z2_p, pool_scaled_p)

    g = jnp.sum(partials, axis=0)[:num_graphs, :c_hidden]             # pooled graph embeddings, f32
    # Classification head (Dropout before it is identity in eval mode).
    return g @ wh + bh


def reference_forward(x, edge_index, batch_idx, params, num_graphs):
    """Pure-JAX f32 reference mirroring the PyTorch forward (eval mode).
    Note: like the PyTorch module it divides by the raw degree (self-loops are assumed present)."""
    w1, b1, w2, b2, wh, bh = params
    N = x.shape[0]
    adj = jnp.zeros((N, N), jnp.float32).at[edge_index[0], edge_index[1]].add(1.0)
    deg = jnp.sum(adj, axis=-1, keepdims=True)
    h = x @ w1 + b1
    h = (adj @ h) / deg
    h = jnp.maximum(h, 0.0)
    h = h @ w2 + b2
    h = (adj @ h) / deg
    onehot = (batch_idx[None, :] == jnp.arange(num_graphs)[:, None]).astype(jnp.float32)
    g = (onehot @ h) / jnp.sum(onehot, axis=1, keepdims=True)
    return g @ wh + bh


def make_params(key, c_in, c_hidden, c_out):
    ks = jax.random.split(key, 6)
    scale = 0.1
    w1 = scale * jax.random.normal(ks[0], (c_in, c_hidden), jnp.float32)
    b1 = scale * jax.random.normal(ks[1], (1, c_hidden), jnp.float32)
    w2 = scale * jax.random.normal(ks[2], (c_hidden, c_hidden), jnp.float32)
    b2 = scale * jax.random.normal(ks[3], (1, c_hidden), jnp.float32)
    wh = scale * jax.random.normal(ks[4], (c_hidden, c_out), jnp.float32)
    bh = scale * jax.random.normal(ks[5], (1, c_out), jnp.float32)
    return (w1, b1, w2, b2, wh, bh)


if __name__ == "__main__":
    key = jax.random.PRNGKey(0)

    # MUTAG-like toy problem, sized so the default (256, 512) tiles give a multi-tile grid
    # (N_r = 768, N_c = 1024 -> grid (3, 2); row axis has >= 2 tiles for megacore sharding).
    c_in, c_hidden, c_out = 7, 32, 2
    num_graphs, nodes_per_graph = 4, 160
    N = num_graphs * nodes_per_graph

    k_x, k_p = jax.random.split(key)
    x = jax.random.normal(k_x, (N, c_in), jnp.float32)

    # Ring graphs with bidirectional edges + self-loops (GCNLayer assumes identity connections
    # are already included, so deg >= 1 everywhere).
    src, dst = [], []
    for g in range(num_graphs):
        off = g * nodes_per_graph
        for i in range(nodes_per_graph):
            a, b = off + i, off + (i + 1) % nodes_per_graph
            src += [a, b, a]
            dst += [b, a, a]   # edge, reverse edge, self-loop
    edge_index = jnp.array([src, dst], dtype=jnp.int32)
    batch_idx = jnp.repeat(jnp.arange(num_graphs, dtype=jnp.int32), nodes_per_graph)

    params = make_params(k_p, c_in, c_hidden, c_out)
    ref = reference_forward(x, edge_index, batch_idx, params, num_graphs)

    # f32 operand path: matches the reference tightly (only float reassociation differences).
    out_f32 = jax.block_until_ready(
        graph_gnn_forward(x, edge_index, batch_idx, params, num_graphs,
                          compute_dtype=jnp.float32))
    assert out_f32.shape == (num_graphs, c_out)
    assert jnp.allclose(out_f32, ref, atol=1e-4, rtol=1e-4), (out_f32, ref)

    # bf16 MXU path with bf16 adjacency stream (default operating point, safe on all chips).
    out_bf16 = jax.block_until_ready(
        graph_gnn_forward(x, edge_index, batch_idx, params, num_graphs,
                          compute_dtype=jnp.bfloat16))
    assert out_bf16.shape == (num_graphs, c_out)
    assert jnp.allclose(out_bf16, ref, atol=3e-2, rtol=3e-2), (out_bf16, ref)

    # int8 adjacency stream (raw edge counts, exact) + bf16 compute: halves the dominant HBM
    # stream on v5e/v6e.  On v7x keep the bf16 path above (no integer MXU; byte saving would
    # instead come from an fp8-e4m3 storage dtype).
    out_i8 = jax.block_until_ready(
        graph_gnn_forward(x, edge_index, batch_idx, params, num_graphs,
                          compute_dtype=jnp.bfloat16, adj_dtype=jnp.int8))
    assert out_i8.shape == (num_graphs, c_out)
    assert jnp.allclose(out_i8, ref, atol=3e-2, rtol=3e-2), (out_i8, ref)

    print("KERNEL_OK")
</pallas_src>

<mosaic_0001>
module attributes {stable_mosaic.version = 11 : i64} {
  func.func @gcn_layer1_kernel(%arg0: i32, %arg1: i32, %arg2: memref<256x512xf32, #tpu.memory_space<vmem>>, %arg3: memref<1024x128xf32, #tpu.memory_space<vmem>>, %arg4: memref<256x1xf32, #tpu.memory_space<vmem>>, %arg5: memref<256x128xf32, #tpu.memory_space<vmem>>, %arg6: memref<256x128xf32, #tpu.memory_space<vmem>>) attributes {dimension_semantics = [#tpu.dimension_semantics<parallel>, #tpu.dimension_semantics<arbitrary>], iteration_bounds = array<i64: 3, 2>, scalar_prefetch = 0 : i64, scratch_operands = 1 : i64, tpu.core_type = #tpu.core_type<tc>, window_params = [{transform_indices = @transform_0, window_bounds = array<i64: 256, 512>}, {pipeline_mode = #tpu.pipeline_mode<synchronous>, transform_indices = @transform_1, window_bounds = array<i64: 1024, 128>}, {transform_indices = @transform_2, window_bounds = array<i64: 256, 1>}, {transform_indices = @transform_3, window_bounds = array<i64: 256, 128>}]} {
    %c0_i32 = arith.constant 0 : i32
    %0 = arith.cmpi eq, %arg1, %c0_i32 : i32
    %1 = arith.extui %0 : i1 to i32
    %c0_i32_0 = arith.constant 0 : i32
    %2 = arith.cmpi ne, %1, %c0_i32_0 : i32
    scf.if %2 {
      %cst_8 = arith.constant 0.000000e+00 : f32
      %15 = vector.broadcast %cst_8 : f32 to vector<256x128xf32>
      %c0_9 = arith.constant 0 : index
      %c0_10 = arith.constant 0 : index
      %16 = vector.load %arg6[%c0_9, %c0_10] : memref<256x128xf32, #tpu.memory_space<vmem>>, vector<256x128xf32>
      tpu.vector_store %arg6[%c0_9, %c0_10], %15 {strides = array<i32>} : memref<256x128xf32, #tpu.memory_space<vmem>>, vector<256x128xf32>,
    } else {
    }
    %c0 = arith.constant 0 : index
    %c0_1 = arith.constant 0 : index
    %3 = vector.load %arg2[%c0, %c0_1] : memref<256x512xf32, #tpu.memory_space<vmem>>, vector<256x512xf32>
    %c512_i32 = arith.constant 512 : i32
    %4 = arith.muli %arg1, %c512_i32 : i32
    %5 = tpu.assume_multiple %4, 512 : i32
    %c0_2 = arith.constant 0 : index
    %c0_3 = arith.constant 0 : index
    %6 = vector.load %arg6[%c0_2, %c0_3] : memref<256x128xf32, #tpu.memory_space<vmem>>, vector<256x128xf32>
    %7 = arith.index_cast %5 : i32 to index
    %c0_4 = arith.constant 0 : index
    %8 = vector.load %arg3[%7, %c0_4] : memref<1024x128xf32, #tpu.memory_space<vmem>>, vector<512x128xf32>
    %cst = arith.constant dense<0.000000e+00> : vector<256x128xf32>
    %9 = tpu.matmul %3, %8, %cst {dimension_numbers = #tpu.dot_dimension_numbers<[1], [0], [0], [1], [0, 0, 1, 1], [], []>} : vector<256x512xf32>, vector<512x128xf32>, vector<256x128xf32> -> vector<256x128xf32>
    %10 = arith.addf %6, %9 : vector<256x128xf32>
    %c0_5 = arith.constant 0 : index
    %c0_6 = arith.constant 0 : index
    %11 = vector.load %arg6[%c0_5, %c0_6] : memref<256x128xf32, #tpu.memory_space<vmem>>, vector<256x128xf32>
    tpu.vector_store %arg6[%c0_5, %c0_6], %10 {strides = array<i32>} : memref<256x128xf32, #tpu.memory_space<vmem>>, vector<256x128xf32>,
    %c1_i32 = arith.constant 1 : i32
    %12 = arith.cmpi eq, %arg1, %c1_i32 : i32
    %13 = arith.extui %12 : i1 to i32
    %c0_i32_7 = arith.constant 0 : i32
    %14 = arith.cmpi ne, %13, %c0_i32_7 : i32
    scf.if %14 {
      %c0_8 = arith.constant 0 : index
      %c0_9 = arith.constant 0 : index
      %15 = vector.load %arg6[%c0_8, %c0_9] : memref<256x128xf32, #tpu.memory_space<vmem>>, vector<256x128xf32>
      %c0_10 = arith.constant 0 : index
      %c0_11 = arith.constant 0 : index
      %16 = vector.load %arg4[%c0_10, %c0_11] : memref<256x1xf32, #tpu.memory_space<vmem>>, vector<256x1xf32>
      %17 = vector.broadcast %16 : vector<256x1xf32> to vector<256x128xf32>
      %18 = arith.mulf %15, %17 : vector<256x128xf32>
      %cst_12 = arith.constant 0.000000e+00 : f32
      %19 = vector.broadcast %cst_12 : f32 to vector<256x128xf32>
      %20 = arith.maximumf %18, %19 : vector<256x128xf32>
      %c0_13 = arith.constant 0 : index
      %c0_14 = arith.constant 0 : index
      %21 = vector.load %arg5[%c0_13, %c0_14] : memref<256x128xf32, #tpu.memory_space<vmem>>, vector<256x128xf32>
      tpu.vector_store %arg5[%c0_13, %c0_14], %20 {strides = array<i32>} : memref<256x128xf32, #tpu.memory_space<vmem>>, vector<256x128xf32>,
    } else {
    }
    return
  }
  func.func @transform_0(%arg0: i32, %arg1: i32) -> (i32, i32) {
    %c0_i32 = arith.constant 0 : i32
    return %arg0, %arg1 : i32, i32
  }
  func.func @transform_1(%arg0: i32, %arg1: i32) -> (i32, i32) {
    %c0_i32 = arith.constant 0 : i32
    %c0_i32_0 = arith.constant 0 : i32
    %c0_i32_1 = arith.constant 0 : i32
    return %c0_i32, %c0_i32_0 : i32, i32
  }
  func.func @transform_2(%arg0: i32, %arg1: i32) -> (i32, i32) {
    %c0_i32 = arith.constant 0 : i32
    %c0_i32_0 = arith.constant 0 : i32
    return %arg0, %c0_i32 : i32, i32
  }
  func.func @transform_3(%arg0: i32, %arg1: i32) -> (i32, i32) {
    %c0_i32 = arith.constant 0 : i32
    %c0_i32_0 = arith.constant 0 : i32
    return %arg0, %c0_i32 : i32, i32
  }
}

</mosaic_0001>

<bundles_post_ra>
// kernel: tpu_custom_call.1
= control target key start
LH: loop header
LB: loop body
LE: loop exit
PB: predicated region body
PF: predicated region fallthrough
CT: control target
= control target key end

     0   :  { %s2509_s0 = inlined_call_operand.hbm [shape: f32[768,1024], index: 0, kind: input, shape index: {}]   ;;  %s2510_s1 = inlined_call_operand.hbm [shape: f32[1024,128], index: 1, kind: input, shape index: {}]   ;;  %s2511_s2 = inlined_call_operand.vmem [shape: f32[768,1], index: 2, kind: input, shape index: {}]   ;;  %s2512_s3 = inlined_call_operand.hbm [shape: f32[768,128], index: 3, kind: output, shape index: {}]  }
   0x1   :  { %2524 = sst [smem:[#allocation17_spill]] %s2510_s1 }
   0x2   :  { %8 = vsyncpa [#allocation4], 0 }
   0x3   :  { %10 = vsyncpa [#allocation4 + $0x1], 0 }
   0x4   :  { %11 = vsyncpa [#allocation7], 0 }
   0x5   :  { %12 = vsyncpa [#allocation5], 0 }
   0x6   :  { %14 = vsyncpa [#allocation5 + $0x1], 0  ;;  %s1937_s12 = smov 0   ;;  %s1939_s13 = smov 0  }
   0x7   :  { %s1941_s14 = smov 0   ;;  %s1943_s15 = smov 0  }
   0x8   :  { %s1945_s16 = smov 0   ;;  %s1947_s17 = smov 0  }
   0x9   :  { %s1949_s18 = smov 0   ;;  %s1951_s19 = smov 0  }
   0xa   :  { %s1953_s20 = smov 0   ;;  %s1955_s21 = smov 0  }
   0xb   :  { %s1957_s22 = smov 0  }
   0xc LB: > { %2525 = sst [smem:[#allocation12_spill]] %s1862_s12  ;;  %s1471_s23 = sadd.s32 4294967295, %s1902_s22   ;;  %s1902_s22 = sphi %s1957_s22, %s20_s22   ;;  %s1898_s21 = sphi %s1955_s21, %s2559_s21   ;;  %s1894_s20 = sphi %s1953_s20, %s2550_s20   ;;  %s1890_s19 = sphi %s1951_s19, %s2558_s19   ;;  %s1886_s18 = sphi %s1949_s18, %s2549_s18   ;;  %s1882_s17 = sphi %s1947_s17, %s2557_s17   ;;  %s1878_s16 = sphi %s1945_s16, %s2556_s16   ;;  %s1874_s15 = sphi %s1943_s15, %s2555_s15   ;;  %s1870_s14 = sphi %s1941_s14, %s2554_s14   ;;  %s1866_s13 = sphi %s1939_s13, %s2553_s13   ;;  %s1862_s12 = sphi %s1937_s12, %s2552_s12  }
   0xd   : > { %2526 = sst [smem:[#allocation13_spill]] %s1894_s20  ;;  %s1472_s24 = sadd.s32 4294967294, %s1902_s22  }
   0xe   : > { %p48_p0 = scmp.ne.s32.totalorder %s1882_s17, %s1878_s16  ;;  %p49_p1 = scmp.eq.s32.totalorder %s1902_s22, 0 }
   0xf   : > { %p54_p2 = scmp.ne.s32.totalorder %s1878_s16, %s1874_s15  ;;  %p1997_p3 = scmp.eq.s32.totalorder %s1471_s23, 0 }
  0x10   : > { %p2002_p4 = por %p49_p1, %p48_p0  ;;  %p124_p5 = scmp.ne.s32.totalorder %s1870_s14, %s1866_s13 }
  0x11   : > { %s2527_s26 = scalar_select %p1997_p3, 1, 0 }
  0x12   : > { %p2010_p6 = por %p1997_p3, %p54_p2  ;;  %p125_p7 = scmp.eq.s32.totalorder %s1471_s23, 5 }
  0x13   : > { %p130_p8 = scmp.ne.s32.totalorder %s1866_s13, %s1862_s12  ;;  %p131_p9 = scmp.eq.s32.totalorder %s1472_s24, 5 }
  0x14   : > { %s2529_s29 = scalar_select %p2010_p6, 1, 0 }
  0x15   : > { %p2016_p10 = por %p125_p7, %p124_p5  ;;  %p1473_p11 = scmp.ge.s32.totalorder %s1902_s22, 1 }
  0x16   : > { %p2021_p12 = por %p131_p9, %p130_p8  ;;  %p138_p13 = scmp.lt.s32.totalorder %s1902_s22, 7 }
  0x17   : > { %s2530_s30 = scalar_select %p2016_p10, 1, 0 }
  0x18   : > { %s2531_s4 = scalar_select %p2021_p12, 1, 0 }
  0x19   : > { %p2026_p0 = pnand %p1473_p11, %p138_p13  ;;  %s1904_s6 = smov [#allocation6]  }
  0x1a   : > { %2532 = sst [smem:[#allocation14_spill]] %s2531_s4  ;;  %s150_s7 = sshll.u32 %s1904_s6, 4  ;;  %s151_s7 = int_to_ptr.vmem [resolvable:$true] %s150_s7 }
  0x1b   : > { %s2533_s5 = scalar_select %p2026_p0, 1, 0 }
  0x1c   : > { %p1601_p1 = pneg %p2026_p0  ;;  %p1614_p2 = scmp.lt.s32.totalorder %s1902_s22, 6 }
  0x1d   : > { %s2536_s1 = sld [smem:[#allocation17_spill]] }
  0x1e   : > { %p2035_p5 = pnand %p1601_p1, %p1997_p3  ;;  %p2041_p7 = pnand %p1614_p2, %p2002_p4 }
  0x20   : > { %s2535_s9 = scalar_select %p2041_p7, 1, 0 }
  0x21   : > { %p1720_p9 = pneg %p2035_p5 }
  0x23   : > { %s1718_s15 = scalar_lea.hbm %s2536_s1, 16384 }
  0x24   : > { %p1719_p8 = scmp.ne.s32.totalorder %s2536_s1, %s1718_s15  ;;  %p1725_p1 = scmp.lt.u32.totalorder %s1718_s15, %s2536_s1 }
  0x26   : > { %p1721_p11 = pnand %p1720_p9, %p1719_p8 }
  0x28   : > { %p1722_p13 = pneg %p1721_p11 }
  0x2a   : > { %p1727_p4 = pnand %p1725_p1, %p1722_p13 }
  0x2c   : > { %1730 = shalt.err (!%p1727_p4)
}
  0x2d   : > { %s1731_s28 = scalar_lea.vmem %s151_s7, 16384  ;;  %p1739_p3 = scmp.lt.s32.totalorder %s151_s7, %s151_s7 }
  0x2e   : > { %p1732_p2 = scmp.ne.s32.totalorder %s151_s7, %s1731_s28  ;;  %p1740_p6 = scmp.lt.s32.totalorder %s1731_s28, %s1731_s28 }
  0x30   : > { %p1734_p12 = pnand %p1732_p2, %p1720_p9  ;;  %p1741_p0 = por %p1740_p6, %p1739_p3 }
  0x32   : > { %p1735_p10 = pneg %p1734_p12 }
  0x34   : > { %p1742_p7 = pnand %p1741_p0, %p1735_p10 }
  0x36   : > { %1745 = shalt.err (!%p1742_p7)
}
  0x37   : > { %s1905_s10 = smov 128   ;;  %s1906_s25 = smov 8  }
  0x38   : > { %1604 = dma.hbm_to_vmem [thread:$0]  (!%p2035_p5), %s2536_s1, 16384, %s151_s7, [#allocation7], %s1905_s10, %s1905_s10, %s1906_s25  }
  0x39   : > { %s29_s23 = sadd.s32 1, %s1894_s20  ;;  %s32_s24 = sadd.s32 1, %s1898_s21 }
  0x3a   : > { %p30_p3 = scmp.ge.s32.totalorder %s29_s23, 2  ;;  %s164_s6 = sand.u32 1, %s1882_s17  }
  0x3b   : > { %s1476_s28 = sshll.u32 %s164_s6, 10  ;;  %s1478_s8 = sshll.u32 %s1894_s20, 2 }
  0x3c   : > { %s2561_s23 = smov (%p30_p3, %s29_s23), 0  ;;  %s2563_s24 = smov (!%p30_p3, %s32_s24), %s1898_s21 }
  0x3d   : > { %2537 = sst [smem:[#allocation15_spill]] %s2561_s23  ;;  %s37_s27 = ssub.s32 %s1894_s20, %s2561_s23 }
  0x3e   : > { %p34_p6 = scmp.ge.s32.totalorder %s2563_s24, 3  ;;  %s1495_s4 = sshll.u32 %s1898_s21, 8 }
  0x3f   : > { %s168_s11 = scalar_lea.vmem [#allocation3], %s1476_s28  ;;  %s175_s10 = sadd.s32 %s1495_s4, %s1478_s8 }
  0x40   : > { %s178_s7 = sshll.u32 %s168_s11, 4  ;;  %s2565_s24 = smov (%p34_p6, %s2563_s24), 0  ;;  %s2073_s7 = int_to_ptr.vmem [resolvable:$true] %s178_s7 }
  0x41   : > { %2538 = sst [smem:[#allocation16_spill]] %s2565_s24  ;;  %s36_s25 = ssub.s32 %s1898_s21, %s2565_s24 }
  0x42   : > { %s1480_s15 = sshll.u32 %s175_s10, 7  ;;  %s38_s1 = sor.u32 %s37_s27, %s36_s25 }
  0x43   : > { %p112_p10 = scmp.eq.s32.totalorder %s36_s25, 0  ;;  %p39_p12 = scmp.eq.s32.totalorder %s38_s1, 0 }
  0x44   : > { %s2080_s20 = scalar_lea.hbm %s2509_s0, %s1480_s15  ;;  %s2539_s28 = sadd.s32 1, %s1870_s14 }
  0x45   : > { %s2085_s11 = scalar_select %p112_p10, %s1870_s14, %s2539_s28  }
  0x46   : > { %s2540_s4 = sadd.s32 1, %s1882_s17  ;;  %s2092_s24 = scalar_lea.sflag [#allocation4], %s164_s6 }
  0x47   : > { %s2090_s8 = scalar_select %p39_p12, %s1882_s17, %s2540_s4  }
  0x48   : > { %s1746_s27 = scalar_lea.hbm %s2080_s20, 16384  ;;  %p2541_p5 = scmp.ne.s32.totalorder %s2535_s9, 0 }
  0x49   : > { %p1747_p0 = scmp.ne.s32.totalorder %s2080_s20, %s1746_s27  ;;  %s1751_s23 = scalar_lea.hbm %s2509_s0, 98304 }
  0x4a   : > { %p1748_p7 = pneg %p2541_p5  ;;  %p1752_p11 = scmp.lt.u32.totalorder %s2080_s20, %s2509_s0 }
  0x4b   : > { %p1753_p13 = scmp.lt.u32.totalorder %s1751_s23, %s1746_s27  ;;  %p1755_p4 = scmp.lt.u32.totalorder %s1746_s27, %s2080_s20 }
  0x4c   : > { %p1749_p8 = pnand %p1748_p7, %p1747_p0 }
  0x4d   : > { %p1754_p1 = por %p1753_p13, %p1752_p11 }
  0x4e   : > { %p1750_p9 = pneg %p1749_p8 }
  0x4f   : > { %p1756_p2 = por %p1755_p4, %p1754_p1 }
  0x51   : > { %p1757_p3 = pnand %p1756_p2, %p1750_p9 }
  0x53   : > { %1760 = shalt.err (!%p1757_p3)
}
  0x54   : > { %s1761_s6 = scalar_lea.vmem %s2073_s7, 16384  ;;  %s1907_s15 = smov [#allocation3]  }
  0x55   : > { %p1762_p6 = scmp.ne.s32.totalorder %s2073_s7, %s1761_s6  ;;  %s1766_s28 = sshll.u32 %s1907_s15, 4  ;;  %s1767_s28 = int_to_ptr.vmem [resolvable:$false] %s1766_s28 }
  0x56   : > { %s1768_s4 = scalar_lea.vmem %s1767_s28, 32768  ;;  %p1769_p0 = scmp.lt.s32.totalorder %s2073_s7, %s1767_s28 }
  0x57   : > { %p1764_p10 = pnand %p1762_p6, %p1748_p7  ;;  %p1770_p8 = scmp.lt.s32.totalorder %s1768_s4, %s1761_s6 }
  0x59   : > { %p1765_p12 = pneg %p1764_p10  ;;  %p1771_p11 = por %p1770_p8, %p1769_p0 }
  0x5b   : > { %p1772_p13 = pnand %p1771_p11, %p1765_p12 }
  0x5d   : > { %1775 = shalt.err (!%p1772_p13)
}
  0x5e   : > { %s1908_s27 = smov 1024   ;;  %s1909_s1 = smov 512  }
  0x5f   : > { %s1910_s12 = smov 32   ;;  %p2542_p7 = scmp.ne.s32.totalorder %s2533_s5, 0 }
  0x60   : > { %1608 = dma.hbm_to_vmem [thread:$0]  (!%p2541_p5), %s2080_s20, 16384, %s2073_s7, %s2092_s24, %s1908_s27, %s1909_s1, %s1910_s12  }
  0x61   : > { %199 = sbr.rel (%p2542_p7) target bundleno = 724 (0x2d4), region = 32  ;;  %s201_s23 = sand.u32 (!%p2542_p7), 1, %s1878_s16  }
  0x62   : > { %s1482_s10 = sshll.u32 (!%p2542_p7), %s201_s23, 10  ;;  %s202_s25 = scalar_lea.sflag (!%p2542_p7), [#allocation4], %s201_s23 }
  0x63   : > { %s2123_s6 = scalar_lea.vmem (!%p2542_p7), [#allocation3], %s1482_s10  ;;  %p2543_p9 = scmp.ne.s32.totalorder (!%p2542_p7), %s2529_s29, 0 }
  0x68   : > { %1849 = dma.done.wait (%p2543_p9), %s202_s25, 16384  }
  0x69   : > { %1851 = vsyncadd (%p2543_p9), %s202_s25, 4294950912  ;;  %p2544_p1 = scmp.ne.s32.totalorder %s2527_s26, 0 }
  0x6b   : > { %1853 = dma.done.wait (%p2544_p1), [#allocation7], 16384  }
  0x6c   : > { %1855 = vsyncadd (%p2544_p1), [#allocation7], 4294950912  ;;  %s234_s20 = sand.u32 1, %s1866_s13   ;;  %s1485_s5 = sshll.u32 %s1890_s19, 5 }
  0x6d   : > { %s1484_s9 = sshll.u32 %s234_s20, 8  ;;  %p240_p5 = scmp.lt.s32.totalorder %s1485_s5, 95 }
  0x6e   : > { %s2142_s28 = scalar_lea.vmem [#allocation8], %s1484_s9  ;;  %p1487_p4 = scmp.ne.s32.totalorder %s1886_s18, 0 }
  0x6f   : > { %s2567_s5 = smov (!%p240_p5, %s1485_s5), 95  ;;  %v1911_v0 = vmov (!%p1487_p4), 0.0  }
  0x70   : > { %s1486_s24 = sshll.u32 %s2567_s5, 3  ;;  %249 = sbr.rel (%p1487_p4) target bundleno = 128 (0x80), region = 44  ;;  %250 = vst [vmem:[#allocation2] sm:$0xff] (!%p1487_p4), %v1911_v0  ;;  %251 = vst [vmem:[#allocation2 + $0x8] sm:$0xff] (!%p1487_p4), %v1911_v0 }
  0x71   : > { %s2140_s29 = scalar_lea.vmem %s2511_s2, %s1486_s24  ;;  %252 = vst [vmem:[#allocation2 + $0x10] sm:$0xff] (!%p1487_p4), %v1911_v0  ;;  %253 = vst [vmem:[#allocation2 + $0x18] sm:$0xff] (!%p1487_p4), %v1911_v0 }
  0x72   : > { %254 = vst [vmem:[#allocation2 + $0x20] sm:$0xff] (!%p1487_p4), %v1911_v0  ;;  %255 = vst [vmem:[#allocation2 + $0x28] sm:$0xff] (!%p1487_p4), %v1911_v0 }
  0x73   : > { %256 = vst [vmem:[#allocation2 + $0x30] sm:$0xff] (!%p1487_p4), %v1911_v0  ;;  %257 = vst [vmem:[#allocation2 + $0x38] sm:$0xff] (!%p1487_p4), %v1911_v0 }
  0x74   : > { %258 = vst [vmem:[#allocation2 + $0x40] sm:$0xff] (!%p1487_p4), %v1911_v0  ;;  %259 = vst [vmem:[#allocation2 + $0x48] sm:$0xff] (!%p1487_p4), %v1911_v0 }
  0x75   : > { %260 = vst [vmem:[#allocation2 + $0x50] sm:$0xff] (!%p1487_p4), %v1911_v0  ;;  %261 = vst [vmem:[#allocation2 + $0x58] sm:$0xff] (!%p1487_p4), %v1911_v0 }
  0x76   : > { %262 = vst [vmem:[#allocation2 + $0x60] sm:$0xff] (!%p1487_p4), %v1911_v0  ;;  %263 = vst [vmem:[#allocation2 + $0x68] sm:$0xff] (!%p1487_p4), %v1911_v0 }
  0x77   : > { %264 = vst [vmem:[#allocation2 + $0x70] sm:$0xff] %v1911_v0  ;;  %265 = vst [vmem:[#allocation2 + $0x78] sm:$0xff] %v1911_v0 }
  0x78   : > { %266 = vst [vmem:[#allocation2 + $0x80] sm:$0xff] %v1911_v0  ;;  %267 = vst [vmem:[#allocation2 + $0x88] sm:$0xff] %v1911_v0 }
  0x79   : > { %268 = vst [vmem:[#allocation2 + $0x90] sm:$0xff] %v1911_v0  ;;  %269 = vst [vmem:[#allocation2 + $0x98] sm:$0xff] %v1911_v0 }
  0x7a   : > { %270 = vst [vmem:[#allocation2 + $0xa0] sm:$0xff] %v1911_v0  ;;  %271 = vst [vmem:[#allocation2 + $0xa8] sm:$0xff] %v1911_v0 }
  0x7b   : > { %272 = vst [vmem:[#allocation2 + $0xb0] sm:$0xff] %v1911_v0  ;;  %273 = vst [vmem:[#allocation2 + $0xb8] sm:$0xff] %v1911_v0 }
  0x7c   : > { %274 = vst [vmem:[#allocation2 + $0xc0] sm:$0xff] %v1911_v0  ;;  %275 = vst [vmem:[#allocation2 + $0xc8] sm:$0xff] %v1911_v0 }
  0x7d   : > { %276 = vst [vmem:[#allocation2 + $0xd0] sm:$0xff] %v1911_v0  ;;  %277 = vst [vmem:[#allocation2 + $0xd8] sm:$0xff] %v1911_v0 }
  0x7e   : > { %278 = vst [vmem:[#allocation2 + $0xe0] sm:$0xff] %v1911_v0  ;;  %279 = vst [vmem:[#allocation2 + $0xe8] sm:$0xff] %v1911_v0 }
  0x7f   : > { %280 = vst [vmem:[#allocation2 + $0xf0] sm:$0xff] %v1911_v0  ;;  %281 = vst [vmem:[#allocation2 + $0xf8] sm:$0xff] %v1911_v0 }
  0x80 PF: > { %s1488_s26 = sshll.u32 %s1886_s18, 9  ;;  %v283_v1 = vld [vmem:[%s2123_s6 + $0x8] sm:$0xff]  ;;  %v285_v2 = vld [vmem:[%s2123_s6 + $0x18] sm:$0xff]  ;;  %v1912_v3 = vmov 0.0|0.0   ;;  %p1489_p2 = scmp.ne.s32.totalorder %s1886_s18, 1 }
  0x81   : > { %1497 = vmatprep.subr.bf16.mxu0 %v1912_v3  ;;  %1545 = vmatprep.subr.bf16.mxu1 %v1912_v3  ;;  %s2150_s4 = scalar_lea.vmem [#allocation6], %s1488_s26 }
  0x82   : > { %v444_v4 = vld [vmem:[%s2150_s4] sm:$0xff]  ;;  %v445_v5 = vld [vmem:[%s2150_s4 + $0x8] sm:$0xff]  ;;  %572 = vmatprep.mubr.f32.mxu0 %v283_v1  ;;  %797 = vmatprep.mubr.f32.mxu1 %v285_v2  ;;  %v446_v9 = vld [vmem:[%s2150_s4 + $0x10] sm:$0xff] }
  0x83   : > { %v476_v6 = vld [vmem:[%s2150_s4 + $0x100] sm:$0xff]  ;;  %v1498_v7 = vpack.c.bf16 %v445_v5, %v444_v4  ;;  %v477_v8 = vld [vmem:[%s2150_s4 + $0x108] sm:$0xff]  ;;  %v447_v10 = vld [vmem:[%s2150_s4 + $0x18] sm:$0xff] }
  0x84   : > { %v1546_v11 = vpack.c.bf16 %v477_v8, %v476_v6  ;;  %v478_v12 = vld [vmem:[%s2150_s4 + $0x110] sm:$0xff]  ;;  %v479_v13 = vld [vmem:[%s2150_s4 + $0x118] sm:$0xff]  ;;  %v1501_v14 = vpack.c.bf16 %v447_v10, %v446_v9  ;;  %v448_v16 = vld [vmem:[%s2150_s4 + $0x20] sm:$0xff] }
  0x85   : > { %1499 = vmatpush1.bf16.msra.mxu0 %v1498_v7  ;;  %v1549_v15 = vpack.c.bf16 %v479_v13, %v478_v12  ;;  %v449_v17 = vld [vmem:[%s2150_s4 + $0x28] sm:$0xff]  ;;  %v480_v18 = vld [vmem:[%s2150_s4 + $0x120] sm:$0xff]  ;;  %v450_v22 = vld [vmem:[%s2150_s4 + $0x30] sm:$0xff] }
  0x86   : > { %1547 = vmatpush1.bf16.msra.mxu1 %v1546_v11  ;;  %1500 = vmatprep.subr.bf16.mxu0 %v1912_v3  ;;  %v481_v19 = vld [vmem:[%s2150_s4 + $0x128] sm:$0xff]  ;;  %v1504_v20 = vpack.c.bf16 %v449_v17, %v448_v16  ;;  %v451_v23 = vld [vmem:[%s2150_s4 + $0x38] sm:$0xff]  ;;  %v482_v24 = vld [vmem:[%s2150_s4 + $0x130] sm:$0xff] }
  0x87   : > { %1548 = vmatprep.subr.bf16.mxu1 %v1912_v3  ;;  %v1552_v21 = vpack.c.bf16 %v481_v19, %v480_v18  ;;  %v483_v25 = vld [vmem:[%s2150_s4 + $0x138] sm:$0xff]  ;;  %v1507_v26 = vpack.c.bf16 %v451_v23, %v450_v22  ;;  %v452_v28 = vld [vmem:[%s2150_s4 + $0x40] sm:$0xff]  ;;  %v453_v29 = vld [vmem:[%s2150_s4 + $0x48] sm:$0xff] }
  0x88   : > { %v1555_v27 = vpack.c.bf16 %v483_v25, %v482_v24  ;;  %v484_v30 = vld [vmem:[%s2150_s4 + $0x140] sm:$0xff]  ;;  %v485_v31 = vld [vmem:[%s2150_s4 + $0x148] sm:$0xff]  ;;  %v1510_v32 = vpack.c.bf16 %v453_v29, %v452_v28  ;;  %v454_v34 = vld [vmem:[%s2150_s4 + $0x50] sm:$0xff] }
  0x89   : > { %1502 = vmatpush1.bf16.msra.mxu0 %v1501_v14  ;;  %v1558_v33 = vpack.c.bf16 %v485_v31, %v484_v30  ;;  %v455_v35 = vld [vmem:[%s2150_s4 + $0x58] sm:$0xff]  ;;  %v486_v36 = vld [vmem:[%s2150_s4 + $0x150] sm:$0xff]  ;;  %v456_v40 = vld [vmem:[%s2150_s4 + $0x60] sm:$0xff] }
  0x8a   : > { %1550 = vmatpush1.bf16.msra.mxu1 %v1549_v15  ;;  %1503 = vmatprep.subr.bf16.mxu0 %v1912_v3  ;;  %v487_v37 = vld [vmem:[%s2150_s4 + $0x158] sm:$0xff]  ;;  %v1513_v38 = vpack.c.bf16 %v455_v35, %v454_v34  ;;  %v457_v41 = vld [vmem:[%s2150_s4 + $0x68] sm:$0xff]  ;;  %v488_v42 = vld [vmem:[%s2150_s4 + $0x160] sm:$0xff] }
  0x8b   : > { %1551 = vmatprep.subr.bf16.mxu1 %v1912_v3  ;;  %v1561_v39 = vpack.c.bf16 %v487_v37, %v486_v36  ;;  %v489_v43 = vld [vmem:[%s2150_s4 + $0x168] sm:$0xff]  ;;  %v1516_v44 = vpack.c.bf16 %v457_v41, %v456_v40  ;;  %v458_v46 = vld [vmem:[%s2150_s4 + $0x70] sm:$0xff]  ;;  %v459_v47 = vld [vmem:[%s2150_s4 + $0x78] sm:$0xff] }
  0x8c   : > { %v1564_v45 = vpack.c.bf16 %v489_v43, %v488_v42  ;;  %v490_v48 = vld [vmem:[%s2150_s4 + $0x170] sm:$0xff]  ;;  %v491_v49 = vld [vmem:[%s2150_s4 + $0x178] sm:$0xff]  ;;  %v1519_v50 = vpack.c.bf16 %v459_v47, %v458_v46  ;;  %v460_v52 = vld [vmem:[%s2150_s4 + $0x80] sm:$0xff] }
  0x8d   : > { %1505 = vmatpush1.bf16.msra.mxu0 %v1504_v20  ;;  %v1567_v51 = vpack.c.bf16 %v491_v49, %v490_v48  ;;  %v461_v53 = vld [vmem:[%s2150_s4 + $0x88] sm:$0xff]  ;;  %v492_v54 = vld [vmem:[%s2150_s4 + $0x180] sm:$0xff]  ;;  %v462_v58 = vld [vmem:[%s2150_s4 + $0x90] sm:$0xff] }
  0x8e   : > { %1553 = vmatpush1.bf16.msra.mxu1 %v1552_v21  ;;  %1506 = vmatprep.subr.bf16.mxu0 %v1912_v3  ;;  %v493_v55 = vld [vmem:[%s2150_s4 + $0x188] sm:$0xff]  ;;  %v1522_v56 = vpack.c.bf16 %v461_v53, %v460_v52  ;;  %v463_v59 = vld [vmem:[%s2150_s4 + $0x98] sm:$0xff]  ;;  %v494_v60 = vld [vmem:[%s2150_s4 + $0x190] sm:$0xff] }
  0x8f   : > { %1554 = vmatprep.subr.bf16.mxu1 %v1912_v3  ;;  %v1570_v57 = vpack.c.bf16 %v493_v55, %v492_v54  ;;  %v495_v61 = vld [vmem:[%s2150_s4 + $0x198] sm:$0xff]  ;;  %v1525_v62 = vpack.c.bf16 %v463_v59, %v462_v58  ;;  %v464_v0 = vld [vmem:[%s2150_s4 + $0xa0] sm:$0xff]  ;;  %v465_v1 = vld [vmem:[%s2150_s4 + $0xa8] sm:$0xff] }
  0x90   : > { %v1573_v63 = vpack.c.bf16 %v495_v61, %v494_v60  ;;  %v496_v2 = vld [vmem:[%s2150_s4 + $0x1a0] sm:$0xff]  ;;  %v497_v4 = vld [vmem:[%s2150_s4 + $0x1a8] sm:$0xff]  ;;  %v1528_v5 = vpack.c.bf16 %v465_v1, %v464_v0  ;;  %v466_v7 = vld [vmem:[%s2150_s4 + $0xb0] sm:$0xff] }
  0x91   : > { %1508 = vmatpush1.bf16.msra.mxu0 %v1507_v26  ;;  %v1576_v6 = vpack.c.bf16 %v497_v4, %v496_v2  ;;  %v467_v8 = vld [vmem:[%s2150_s4 + $0xb8] sm:$0xff]  ;;  %v498_v9 = vld [vmem:[%s2150_s4 + $0x1b0] sm:$0xff]  ;;  %v468_v13 = vld [vmem:[%s2150_s4 + $0xc0] sm:$0xff] }
  0x92   : > { %1556 = vmatpush1.bf16.msra.mxu1 %v1555_v27  ;;  %1509 = vmatprep.subr.bf16.mxu0 %v1912_v3  ;;  %v499_v10 = vld [vmem:[%s2150_s4 + $0x1b8] sm:$0xff]  ;;  %v1531_v11 = vpack.c.bf16 %v467_v8, %v466_v7  ;;  %v469_v14 = vld [vmem:[%s2150_s4 + $0xc8] sm:$0xff]  ;;  %v500_v15 = vld [vmem:[%s2150_s4 + $0x1c0] sm:$0xff] }
  0x93   : > { %1557 = vmatprep.subr.bf16.mxu1 %v1912_v3  ;;  %v1579_v12 = vpack.c.bf16 %v499_v10, %v498_v9  ;;  %v501_v16 = vld [vmem:[%s2150_s4 + $0x1c8] sm:$0xff]  ;;  %v1534_v17 = vpack.c.bf16 %v469_v14, %v468_v13  ;;  %v470_v19 = vld [vmem:[%s2150_s4 + $0xd0] sm:$0xff]  ;;  %v471_v20 = vld [vmem:[%s2150_s4 + $0xd8] sm:$0xff] }
  0x94   : > { %v1582_v18 = vpack.c.bf16 %v501_v16, %v500_v15  ;;  %v502_v21 = vld [vmem:[%s2150_s4 + $0x1d0] sm:$0xff]  ;;  %v503_v22 = vld [vmem:[%s2150_s4 + $0x1d8] sm:$0xff]  ;;  %v1537_v23 = vpack.c.bf16 %v471_v20, %v470_v19  ;;  %v472_v25 = vld [vmem:[%s2150_s4 + $0xe0] sm:$0xff] }
  0x95   : > { %1511 = vmatpush1.bf16.msra.mxu0 %v1510_v32  ;;  %v1585_v24 = vpack.c.bf16 %v503_v22, %v502_v21  ;;  %v473_v26 = vld [vmem:[%s2150_s4 + $0xe8] sm:$0xff]  ;;  %v504_v27 = vld [vmem:[%s2150_s4 + $0x1e0] sm:$0xff]  ;;  %v474_v31 = vld [vmem:[%s2150_s4 + $0xf0] sm:$0xff] }
  0x96   : > { %1559 = vmatpush1.bf16.msra.mxu1 %v1558_v33  ;;  %1512 = vmatprep.subr.bf16.mxu0 %v1912_v3  ;;  %v505_v28 = vld [vmem:[%s2150_s4 + $0x1e8] sm:$0xff]  ;;  %v1540_v29 = vpack.c.bf16 %v473_v26, %v472_v25  ;;  %v475_v32 = vld [vmem:[%s2150_s4 + $0xf8] sm:$0xff]  ;;  %v506_v33 = vld [vmem:[%s2150_s4 + $0x1f0] sm:$0xff] }
  0x97   : > { %1560 = vmatprep.subr.bf16.mxu1 %v1912_v3  ;;  %v1588_v30 = vpack.c.bf16 %v505_v28, %v504_v27  ;;  %v507_v34 = vld [vmem:[%s2150_s4 + $0x1f8] sm:$0xff]  ;;  %v1543_v35 = vpack.c.bf16 %v475_v32, %v474_v31  ;;  %v282_v37 = vld [vmem:[%s2123_s6] sm:$0xff]  ;;  %v288_v42 = vld [vmem:[%s2123_s6 + $0x30] sm:$0xff] }
  0x98   : > { %v1591_v36 = vpack.c.bf16 %v507_v34, %v506_v33  ;;  %v289_v40 = vld [vmem:[%s2123_s6 + $0x38] sm:$0xff]  ;;  %v286_v41 = vld [vmem:[%s2123_s6 + $0x20] sm:$0xff]  ;;  %v291_v43 = vld [vmem:[%s2123_s6 + $0x48] sm:$0xff] }
  0x99   : > { %1514 = vmatpush1.bf16.msra.mxu0 %v1513_v38  ;;  %v284_v38 = vld [vmem:[%s2123_s6 + $0x10] sm:$0xff]  ;;  %v295_v46 = vld [vmem:[%s2123_s6 + $0x68] sm:$0xff]  ;;  %v297_v47 = vld [vmem:[%s2123_s6 + $0x78] sm:$0xff] }
  0x9a   : > { %1562 = vmatpush1.bf16.msra.mxu1 %v1561_v39  ;;  %1515 = vmatprep.subr.bf16.mxu0 %v1912_v3  ;;  %v287_v39 = vld [vmem:[%s2123_s6 + $0x28] sm:$0xff]  ;;  %v294_v48 = vld [vmem:[%s2123_s6 + $0x60] sm:$0xff]  ;;  %v296_v49 = vld [vmem:[%s2123_s6 + $0x70] sm:$0xff] }
  0x9b   : > { %1563 = vmatprep.subr.bf16.mxu1 %v1912_v3  ;;  %v298_v52 = vld [vmem:[%s2123_s6 + $0x80] sm:$0xff]  ;;  %v300_v53 = vld [vmem:[%s2123_s6 + $0x90] sm:$0xff]  ;;  %v303_v54 = vld [vmem:[%s2123_s6 + $0xa8] sm:$0xff] }
  0x9c   : > { %v305_v55 = vld [vmem:[%s2123_s6 + $0xb8] sm:$0xff]  ;;  %v307_v58 = vld [vmem:[%s2123_s6 + $0xc8] sm:$0xff]  ;;  %v306_v60 = vld [vmem:[%s2123_s6 + $0xc0] sm:$0xff] }
  0x9d   : > { %1517 = vmatpush1.bf16.msra.mxu0 %v1516_v44  ;;  %v290_v44 = vld [vmem:[%s2123_s6 + $0x40] sm:$0xff]  ;;  %v309_v59 = vld [vmem:[%s2123_s6 + $0xd8] sm:$0xff]  ;;  %v308_v61 = vld [vmem:[%s2123_s6 + $0xd0] sm:$0xff] }
  0x9e   : > { %1565 = vmatpush1.bf16.msra.mxu1 %v1564_v45  ;;  %1518 = vmatprep.subr.bf16.mxu0 %v1912_v3  ;;  %v292_v45 = vld [vmem:[%s2123_s6 + $0x50] sm:$0xff]  ;;  %v310_v0 = vld [vmem:[%s2123_s6 + $0xe0] sm:$0xff]  ;;  %v315_v2 = vld [vmem:[%s2123_s6 + $0x108] sm:$0xff] }
  0x9f   : > { %1566 = vmatprep.subr.bf16.mxu1 %v1912_v3  ;;  %v312_v1 = vld [vmem:[%s2123_s6 + $0xf0] sm:$0xff]  ;;  %v317_v4 = vld [vmem:[%s2123_s6 + $0x118] sm:$0xff]  ;;  %v319_v7 = vld [vmem:[%s2123_s6 + $0x128] sm:$0xff] }
  0xa0   : > { %v321_v8 = vld [vmem:[%s2123_s6 + $0x138] sm:$0xff]  ;;  %v318_v9 = vld [vmem:[%s2123_s6 + $0x120] sm:$0xff]  ;;  %v320_v10 = vld [vmem:[%s2123_s6 + $0x130] sm:$0xff] }
  0xa1   : > { %1520 = vmatpush1.bf16.msra.mxu0 %v1519_v50  ;;  %v299_v50 = vld [vmem:[%s2123_s6 + $0x88] sm:$0xff]  ;;  %v322_v13 = vld [vmem:[%s2123_s6 + $0x140] sm:$0xff]  ;;  %v324_v14 = vld [vmem:[%s2123_s6 + $0x150] sm:$0xff] }
  0xa2   : > { %1568 = vmatpush1.bf16.msra.mxu1 %v1567_v51  ;;  %1521 = vmatprep.subr.bf16.mxu0 %v1912_v3  ;;  %v301_v51 = vld [vmem:[%s2123_s6 + $0x98] sm:$0xff]  ;;  %v327_v15 = vld [vmem:[%s2123_s6 + $0x168] sm:$0xff]  ;;  %v330_v21 = vld [vmem:[%s2123_s6 + $0x180] sm:$0xff] }
  0xa3   : > { %1569 = vmatprep.subr.bf16.mxu1 %v1912_v3  ;;  %v329_v16 = vld [vmem:[%s2123_s6 + $0x178] sm:$0xff]  ;;  %v331_v19 = vld [vmem:[%s2123_s6 + $0x188] sm:$0xff]  ;;  %v332_v22 = vld [vmem:[%s2123_s6 + $0x190] sm:$0xff] }
  0xa4   : > { %v333_v20 = vld [vmem:[%s2123_s6 + $0x198] sm:$0xff]  ;;  %v334_v25 = vld [vmem:[%s2123_s6 + $0x1a0] sm:$0xff]  ;;  %v336_v26 = vld [vmem:[%s2123_s6 + $0x1b0] sm:$0xff] }
  0xa5   : > { %1523 = vmatpush1.bf16.msra.mxu0 %v1522_v56  ;;  %v302_v56 = vld [vmem:[%s2123_s6 + $0xa0] sm:$0xff]  ;;  %v339_v27 = vld [vmem:[%s2123_s6 + $0x1c8] sm:$0xff]  ;;  %v341_v28 = vld [vmem:[%s2123_s6 + $0x1d8] sm:$0xff] }
  0xa6   : > { %1571 = vmatpush1.bf16.msra.mxu1 %v1570_v57  ;;  %1524 = vmatprep.subr.bf16.mxu0 %v1912_v3  ;;  %v304_v57 = vld [vmem:[%s2123_s6 + $0xb0] sm:$0xff]  ;;  %v343_v31 = vld [vmem:[%s2123_s6 + $0x1e8] sm:$0xff]  ;;  %v345_v32 = vld [vmem:[%s2123_s6 + $0x1f8] sm:$0xff] }
  0xa7   : > { %1572 = vmatprep.subr.bf16.mxu1 %v1912_v3  ;;  %v342_v33 = vld [vmem:[%s2123_s6 + $0x1e0] sm:$0xff]  ;;  %v344_v34 = vld [vmem:[%s2123_s6 + $0x1f0] sm:$0xff] }
  0xa9   : > { %1526 = vmatpush1.bf16.msra.mxu0 %v1525_v62  ;;  %v311_v62 = vld [vmem:[%s2123_s6 + $0xe8] sm:$0xff] }
  0xaa   : > { %1574 = vmatpush1.bf16.msra.mxu1 %v1573_v63  ;;  %1527 = vmatprep.subr.bf16.mxu0 %v1912_v3  ;;  %v313_v63 = vld [vmem:[%s2123_s6 + $0xf8] sm:$0xff] }
  0xab   : > { %1575 = vmatprep.subr.bf16.mxu1 %v1912_v3 }
  0xad   : > { %1529 = vmatpush1.bf16.msra.mxu0 %v1528_v5  ;;  %v314_v5 = vld [vmem:[%s2123_s6 + $0x100] sm:$0xff] }
  0xae   : > { %1577 = vmatpush1.bf16.msra.mxu1 %v1576_v6  ;;  %1530 = vmatprep.subr.bf16.mxu0 %v1912_v3  ;;  %v316_v6 = vld [vmem:[%s2123_s6 + $0x110] sm:$0xff] }
  0xaf   : > { %1578 = vmatprep.subr.bf16.mxu1 %v1912_v3 }
  0xb1   : > { %1532 = vmatpush1.bf16.msra.mxu0 %v1531_v11  ;;  %v323_v11 = vld [vmem:[%s2123_s6 + $0x148] sm:$0xff] }
  0xb2   : > { %1580 = vmatpush1.bf16.msra.mxu1 %v1579_v12  ;;  %1533 = vmatprep.subr.bf16.mxu0 %v1912_v3  ;;  %v325_v12 = vld [vmem:[%s2123_s6 + $0x158] sm:$0xff] }
  0xb3   : > { %1581 = vmatprep.subr.bf16.mxu1 %v1912_v3 }
  0xb5   : > { %1535 = vmatpush1.bf16.msra.mxu0 %v1534_v17  ;;  %v326_v17 = vld [vmem:[%s2123_s6 + $0x160] sm:$0xff] }
  0xb6   : > { %1583 = vmatpush1.bf16.msra.mxu1 %v1582_v18  ;;  %1536 = vmatprep.subr.bf16.mxu0 %v1912_v3  ;;  %v328_v18 = vld [vmem:[%s2123_s6 + $0x170] sm:$0xff] }
  0xb7   : > { %1584 = vmatprep.subr.bf16.mxu1 %v1912_v3 }
  0xb9   : > { %1538 = vmatpush1.bf16.msra.mxu0 %v1537_v23  ;;  %v335_v23 = vld [vmem:[%s2123_s6 + $0x1a8] sm:$0xff] }
  0xba   : > { %1586 = vmatpush1.bf16.msra.mxu1 %v1585_v24  ;;  %1539 = vmatprep.subr.bf16.mxu0 %v1912_v3  ;;  %v337_v24 = vld [vmem:[%s2123_s6 + $0x1b8] sm:$0xff] }
  0xbb   : > { %1587 = vmatprep.subr.bf16.mxu1 %v1912_v3 }
  0xbd   : > { %1541 = vmatpush1.bf16.msra.mxu0 %v1540_v29  ;;  %v338_v29 = vld [vmem:[%s2123_s6 + $0x1c0] sm:$0xff] }
  0xbe   : > { %1589 = vmatpush1.bf16.msra.mxu1 %v1588_v30  ;;  %1542 = vmatprep.subr.bf16.mxu0 %v1912_v3  ;;  %v340_v30 = vld [vmem:[%s2123_s6 + $0x1d0] sm:$0xff] }
  0xbf   : > { %1590 = vmatprep.subr.bf16.mxu1 %v1912_v3  ;;  %v293_v3 = vld [vmem:[%s2123_s6 + $0x58] sm:$0xff] }
  0xc1   : > { %1544 = vmatpush1.bf16.msra.mxu0 %v1543_v35  ;;  %v347_v35 = vld [vmem:[%s2123_s6 + $0x208] sm:$0xff] }
  0xc2   : > { %1592 = vmatpush1.bf16.msra.mxu1 %v1591_v36  ;;  %v349_v36 = vld [vmem:[%s2123_s6 + $0x218] sm:$0xff] }
  0xc4   : > { %573 = vmatmul.mubr.f32.vlgmr.msra.gmra.mrb[0].mxu0 %v282_v37  ;;  %v346_v37 = vld [vmem:[%s2123_s6 + $0x200] sm:$0xff] }
  0xc5   : > { %798 = vmatmul.mubr.f32.vlgmr.msra.gmra.mrb[0].mxu1 %v284_v38  ;;  %577 = vmatprep.mubr.f32.mxu0 %v287_v39  ;;  %v348_v38 = vld [vmem:[%s2123_s6 + $0x210] sm:$0xff]  ;;  %v351_v39 = vld [vmem:[%s2123_s6 + $0x228] sm:$0xff] }
  0xc6   : > { %802 = vmatprep.mubr.f32.mxu1 %v289_v40  ;;  %v353_v40 = vld [vmem:[%s2123_s6 + $0x238] sm:$0xff] }
  0xc8   : > { %578 = vmatmul.mubr.f32.gmra.mrb[2].mxu0 %v286_v41  ;;  %v350_v41 = vld [vmem:[%s2123_s6 + $0x220] sm:$0xff] }
  0xc9   : > { %803 = vmatmul.mubr.f32.gmra.mrb[2].mxu1 %v288_v42  ;;  %582 = vmatprep.mubr.f32.mxu0 %v291_v43  ;;  %v352_v42 = vld [vmem:[%s2123_s6 + $0x230] sm:$0xff]  ;;  %v355_v43 = vld [vmem:[%s2123_s6 + $0x248] sm:$0xff] }
  0xca   : > { %807 = vmatprep.mubr.f32.mxu1 %v293_v3  ;;  %v357_v3 = vld [vmem:[%s2123_s6 + $0x258] sm:$0xff] }
  0xcc   : > { %583 = vmatmul.mubr.f32.gmra.mrb[4].mxu0 %v290_v44  ;;  %v354_v44 = vld [vmem:[%s2123_s6 + $0x240] sm:$0xff] }
  0xcd   : > { %808 = vmatmul.mubr.f32.gmra.mrb[4].mxu1 %v292_v45  ;;  %587 = vmatprep.mubr.f32.mxu0 %v295_v46  ;;  %v356_v45 = vld [vmem:[%s2123_s6 + $0x250] sm:$0xff]  ;;  %v359_v46 = vld [vmem:[%s2123_s6 + $0x268] sm:$0xff] }
  0xce   : > { %812 = vmatprep.mubr.f32.mxu1 %v297_v47  ;;  %v361_v47 = vld [vmem:[%s2123_s6 + $0x278] sm:$0xff] }
  0xd0   : > { %588 = vmatmul.mubr.f32.gmra.mrb[6].mxu0 %v294_v48  ;;  %v358_v48 = vld [vmem:[%s2123_s6 + $0x260] sm:$0xff] }
  0xd1   : > { %813 = vmatmul.mubr.f32.gmra.mrb[6].mxu1 %v296_v49  ;;  %592 = vmatprep.mubr.f32.mxu0 %v299_v50  ;;  %v360_v49 = vld [vmem:[%s2123_s6 + $0x270] sm:$0xff]  ;;  %v363_v50 = vld [vmem:[%s2123_s6 + $0x288] sm:$0xff] }
  0xd2   : > { %817 = vmatprep.mubr.f32.mxu1 %v301_v51  ;;  %v365_v51 = vld [vmem:[%s2123_s6 + $0x298] sm:$0xff] }
  0xd4   : > { %593 = vmatmul.mubr.f32.gmra.mrb[8].mxu0 %v298_v52  ;;  %v362_v52 = vld [vmem:[%s2123_s6 + $0x280] sm:$0xff] }
  0xd5   : > { %818 = vmatmul.mubr.f32.gmra.mrb[8].mxu1 %v300_v53  ;;  %597 = vmatprep.mubr.f32.mxu0 %v303_v54  ;;  %v364_v53 = vld [vmem:[%s2123_s6 + $0x290] sm:$0xff]  ;;  %v367_v54 = vld [vmem:[%s2123_s6 + $0x2a8] sm:$0xff] }
  0xd6   : > { %822 = vmatprep.mubr.f32.mxu1 %v305_v55  ;;  %v369_v55 = vld [vmem:[%s2123_s6 + $0x2b8] sm:$0xff] }
  0xd8   : > { %598 = vmatmul.mubr.f32.gmra.mrb[10].mxu0 %v302_v56  ;;  %v366_v56 = vld [vmem:[%s2123_s6 + $0x2a0] sm:$0xff] }
  0xd9   : > { %823 = vmatmul.mubr.f32.gmra.mrb[10].mxu1 %v304_v57  ;;  %602 = vmatprep.mubr.f32.mxu0 %v307_v58  ;;  %v368_v57 = vld [vmem:[%s2123_s6 + $0x2b0] sm:$0xff]  ;;  %v371_v58 = vld [vmem:[%s2123_s6 + $0x2c8] sm:$0xff] }
  0xda   : > { %827 = vmatprep.mubr.f32.mxu1 %v309_v59  ;;  %v373_v59 = vld [vmem:[%s2123_s6 + $0x2d8] sm:$0xff] }
  0xdc   : > { %603 = vmatmul.mubr.f32.gmra.mrb[12].mxu0 %v306_v60  ;;  %v370_v60 = vld [vmem:[%s2123_s6 + $0x2c0] sm:$0xff] }
  0xdd   : > { %828 = vmatmul.mubr.f32.gmra.mrb[12].mxu1 %v308_v61  ;;  %607 = vmatprep.mubr.f32.mxu0 %v311_v62  ;;  %v372_v61 = vld [vmem:[%s2123_s6 + $0x2d0] sm:$0xff]  ;;  %v375_v62 = vld [vmem:[%s2123_s6 + $0x2e8] sm:$0xff] }
  0xde   : > { %832 = vmatprep.mubr.f32.mxu1 %v313_v63  ;;  %v377_v63 = vld [vmem:[%s2123_s6 + $0x2f8] sm:$0xff] }
  0xe0   : > { %608 = vmatmul.mubr.f32.gmra.mrb[14].mxu0 %v310_v0  ;;  %v374_v0 = vld [vmem:[%s2123_s6 + $0x2e0] sm:$0xff] }
  0xe1   : > { %833 = vmatmul.mubr.f32.gmra.mrb[14].mxu1 %v312_v1  ;;  %612 = vmatprep.mubr.f32.mxu0 %v315_v2  ;;  %v376_v1 = vld [vmem:[%s2123_s6 + $0x2f0] sm:$0xff]  ;;  %v379_v2 = vld [vmem:[%s2123_s6 + $0x308] sm:$0xff] }
  0xe2   : > { %837 = vmatprep.mubr.f32.mxu1 %v317_v4  ;;  %v381_v4 = vld [vmem:[%s2123_s6 + $0x318] sm:$0xff] }
  0xe4   : > { %613 = vmatmul.mubr.f32.gmra.mrb[16].mxu0 %v314_v5  ;;  %v378_v5 = vld [vmem:[%s2123_s6 + $0x300] sm:$0xff] }
  0xe5   : > { %838 = vmatmul.mubr.f32.gmra.mrb[16].mxu1 %v316_v6  ;;  %617 = vmatprep.mubr.f32.mxu0 %v319_v7  ;;  %v380_v6 = vld [vmem:[%s2123_s6 + $0x310] sm:$0xff]  ;;  %v383_v7 = vld [vmem:[%s2123_s6 + $0x328] sm:$0xff] }
  0xe6   : > { %842 = vmatprep.mubr.f32.mxu1 %v321_v8  ;;  %v385_v8 = vld [vmem:[%s2123_s6 + $0x338] sm:$0xff] }
  0xe8   : > { %618 = vmatmul.mubr.f32.gmra.mrb[18].mxu0 %v318_v9  ;;  %v382_v9 = vld [vmem:[%s2123_s6 + $0x320] sm:$0xff] }
  0xe9   : > { %843 = vmatmul.mubr.f32.gmra.mrb[18].mxu1 %v320_v10  ;;  %622 = vmatprep.mubr.f32.mxu0 %v323_v11  ;;  %v384_v10 = vld [vmem:[%s2123_s6 + $0x330] sm:$0xff]  ;;  %v387_v11 = vld [vmem:[%s2123_s6 + $0x348] sm:$0xff] }
  0xea   : > { %847 = vmatprep.mubr.f32.mxu1 %v325_v12  ;;  %v389_v12 = vld [vmem:[%s2123_s6 + $0x358] sm:$0xff] }
  0xec   : > { %623 = vmatmul.mubr.f32.gmra.mrb[20].mxu0 %v322_v13  ;;  %v386_v13 = vld [vmem:[%s2123_s6 + $0x340] sm:$0xff] }
  0xed   : > { %848 = vmatmul.mubr.f32.gmra.mrb[20].mxu1 %v324_v14  ;;  %627 = vmatprep.mubr.f32.mxu0 %v327_v15  ;;  %v388_v14 = vld [vmem:[%s2123_s6 + $0x350] sm:$0xff]  ;;  %v391_v15 = vld [vmem:[%s2123_s6 + $0x368] sm:$0xff] }
  0xee   : > { %852 = vmatprep.mubr.f32.mxu1 %v329_v16  ;;  %v393_v16 = vld [vmem:[%s2123_s6 + $0x378] sm:$0xff] }
  0xf0   : > { %628 = vmatmul.mubr.f32.gmra.mrb[22].mxu0 %v326_v17  ;;  %v390_v17 = vld [vmem:[%s2123_s6 + $0x360] sm:$0xff] }
  0xf1   : > { %853 = vmatmul.mubr.f32.gmra.mrb[22].mxu1 %v328_v18  ;;  %632 = vmatprep.mubr.f32.mxu0 %v331_v19  ;;  %v392_v18 = vld [vmem:[%s2123_s6 + $0x370] sm:$0xff]  ;;  %v395_v19 = vld [vmem:[%s2123_s6 + $0x388] sm:$0xff] }
  0xf2   : > { %857 = vmatprep.mubr.f32.mxu1 %v333_v20  ;;  %v397_v20 = vld [vmem:[%s2123_s6 + $0x398] sm:$0xff] }
  0xf4   : > { %633 = vmatmul.mubr.f32.gmra.mrb[24].mxu0 %v330_v21  ;;  %v394_v21 = vld [vmem:[%s2123_s6 + $0x380] sm:$0xff] }
  0xf5   : > { %858 = vmatmul.mubr.f32.gmra.mrb[24].mxu1 %v332_v22  ;;  %637 = vmatprep.mubr.f32.mxu0 %v335_v23  ;;  %v396_v22 = vld [vmem:[%s2123_s6 + $0x390] sm:$0xff]  ;;  %v399_v23 = vld [vmem:[%s2123_s6 + $0x3a8] sm:$0xff] }
  0xf6   : > { %862 = vmatprep.mubr.f32.mxu1 %v337_v24  ;;  %v401_v24 = vld [vmem:[%s2123_s6 + $0x3b8] sm:$0xff] }
  0xf8   : > { %638 = vmatmul.mubr.f32.gmra.mrb[26].mxu0 %v334_v25  ;;  %v398_v25 = vld [vmem:[%s2123_s6 + $0x3a0] sm:$0xff] }
  0xf9   : > { %863 = vmatmul.mubr.f32.gmra.mrb[26].mxu1 %v336_v26  ;;  %642 = vmatprep.mubr.f32.mxu0 %v339_v27  ;;  %v400_v26 = vld [vmem:[%s2123_s6 + $0x3b0] sm:$0xff]  ;;  %v403_v27 = vld [vmem:[%s2123_s6 + $0x3c8] sm:$0xff] }
  0xfa   : > { %867 = vmatprep.mubr.f32.mxu1 %v341_v28  ;;  %v405_v28 = vld [vmem:[%s2123_s6 + $0x3d8] sm:$0xff] }
  0xfc   : > { %643 = vmatmul.mubr.f32.gmra.mrb[28].mxu0 %v338_v29  ;;  %v402_v29 = vld [vmem:[%s2123_s6 + $0x3c0] sm:$0xff] }
  0xfd   : > { %868 = vmatmul.mubr.f32.gmra.mrb[28].mxu1 %v340_v30  ;;  %647 = vmatprep.mubr.f32.mxu0 %v343_v31  ;;  %v404_v30 = vld [vmem:[%s2123_s6 + $0x3d0] sm:$0xff]  ;;  %v407_v31 = vld [vmem:[%s2123_s6 + $0x3e8] sm:$0xff] }
  0xfe   : > { %872 = vmatprep.mubr.f32.mxu1 %v345_v32  ;;  %v409_v32 = vld [vmem:[%s2123_s6 + $0x3f8] sm:$0xff] }
 0x100   : > { %648 = vmatmul.mubr.f32.gmra.mrb[30].mxu0 %v342_v33  ;;  %v406_v33 = vld [vmem:[%s2123_s6 + $0x3e0] sm:$0xff] }
 0x101   : > { %873 = vmatmul.mubr.f32.gmra.mrb[30].mxu1 %v344_v34  ;;  %652 = vmatprep.mubr.f32.mxu0 %v347_v35  ;;  %v408_v34 = vld [vmem:[%s2123_s6 + $0x3f0] sm:$0xff] }
 0x102   : > { %877 = vmatprep.mubr.f32.mxu1 %v349_v36  ;;  %v411_v36 = vld [vmem:[#allocation2] sm:$0xff] }
 0x104   : > { %653 = vmatmul.mubr.f32.gmra.mrb[32].mxu0 %v346_v37 }
 0x105   : > { %878 = vmatmul.mubr.f32.gmra.mrb[32].mxu1 %v348_v38  ;;  %657 = vmatprep.mubr.f32.mxu0 %v351_v39 }
 0x106   : > { %882 = vmatprep.mubr.f32.mxu1 %v353_v40 }
 0x108   : > { %658 = vmatmul.mubr.f32.gmra.mrb[34].mxu0 %v350_v41 }
 0x109   : > { %883 = vmatmul.mubr.f32.gmra.mrb[34].mxu1 %v352_v42  ;;  %662 = vmatprep.mubr.f32.mxu0 %v355_v43  ;;  %v412_v43 = vld [vmem:[#allocation2 + $0x8] sm:$0xff] }
 0x10a   : > { %887 = vmatprep.mubr.f32.mxu1 %v357_v3 }
 0x10c   : > { %663 = vmatmul.mubr.f32.gmra.mrb[36].mxu0 %v354_v44 }
 0x10d   : > { %888 = vmatmul.mubr.f32.gmra.mrb[36].mxu1 %v356_v45  ;;  %667 = vmatprep.mubr.f32.mxu0 %v359_v46 }
 0x10e   : > { %892 = vmatprep.mubr.f32.mxu1 %v361_v47 }
 0x110   : > { %668 = vmatmul.mubr.f32.gmra.mrb[38].mxu0 %v358_v48 }
 0x111   : > { %893 = vmatmul.mubr.f32.gmra.mrb[38].mxu1 %v360_v49  ;;  %672 = vmatprep.mubr.f32.mxu0 %v363_v50  ;;  %v413_v49 = vld [vmem:[#allocation2 + $0x10] sm:$0xff] }
 0x112   : > { %897 = vmatprep.mubr.f32.mxu1 %v365_v51 }
 0x114   : > { %673 = vmatmul.mubr.f32.gmra.mrb[40].mxu0 %v362_v52 }
 0x115   : > { %898 = vmatmul.mubr.f32.gmra.mrb[40].mxu1 %v364_v53  ;;  %677 = vmatprep.mubr.f32.mxu0 %v367_v54 }
 0x116   : > { %902 = vmatprep.mubr.f32.mxu1 %v369_v55 }
 0x118   : > { %678 = vmatmul.mubr.f32.gmra.mrb[42].mxu0 %v366_v56  ;;  %v414_v56 = vld [vmem:[#allocation2 + $0x18] sm:$0xff] }
 0x119   : > { %903 = vmatmul.mubr.f32.gmra.mrb[42].mxu1 %v368_v57  ;;  %682 = vmatprep.mubr.f32.mxu0 %v371_v58 }
 0x11a   : > { %907 = vmatprep.mubr.f32.mxu1 %v373_v59 }
 0x11c   : > { %683 = vmatmul.mubr.f32.gmra.mrb[44].mxu0 %v370_v60 }
 0x11d   : > { %908 = vmatmul.mubr.f32.gmra.mrb[44].mxu1 %v372_v61  ;;  %687 = vmatprep.mubr.f32.mxu0 %v375_v62 }
 0x11e   : > { %912 = vmatprep.mubr.f32.mxu1 %v377_v63  ;;  %v415_v63 = vld [vmem:[#allocation2 + $0x20] sm:$0xff] }
 0x120   : > { %688 = vmatmul.mubr.f32.gmra.mrb[46].mxu0 %v374_v0 }
 0x121   : > { %913 = vmatmul.mubr.f32.gmra.mrb[46].mxu1 %v376_v1  ;;  %692 = vmatprep.mubr.f32.mxu0 %v379_v2 }
 0x122   : > { %917 = vmatprep.mubr.f32.mxu1 %v381_v4 }
 0x124   : > { %693 = vmatmul.mubr.f32.gmra.mrb[48].mxu0 %v378_v5 }
 0x125   : > { %918 = vmatmul.mubr.f32.gmra.mrb[48].mxu1 %v380_v6  ;;  %697 = vmatprep.mubr.f32.mxu0 %v383_v7  ;;  %v416_v7 = vld [vmem:[#allocation2 + $0x28] sm:$0xff] }
 0x126   : > { %922 = vmatprep.mubr.f32.mxu1 %v385_v8 }
 0x128   : > { %698 = vmatmul.mubr.f32.gmra.mrb[50].mxu0 %v382_v9 }
 0x129   : > { %923 = vmatmul.mubr.f32.gmra.mrb[50].mxu1 %v384_v10  ;;  %702 = vmatprep.mubr.f32.mxu0 %v387_v11 }
 0x12a   : > { %927 = vmatprep.mubr.f32.mxu1 %v389_v12 }
 0x12c   : > { %703 = vmatmul.mubr.f32.gmra.mrb[52].mxu0 %v386_v13 }
 0x12d   : > { %928 = vmatmul.mubr.f32.gmra.mrb[52].mxu1 %v388_v14  ;;  %707 = vmatprep.mubr.f32.mxu0 %v391_v15  ;;  %v417_v14 = vld [vmem:[#allocation2 + $0x30] sm:$0xff] }
 0x12e   : > { %932 = vmatprep.mubr.f32.mxu1 %v393_v16 }
 0x130   : > { %708 = vmatmul.mubr.f32.gmra.mrb[54].mxu0 %v390_v17 }
 0x131   : > { %933 = vmatmul.mubr.f32.gmra.mrb[54].mxu1 %v392_v18  ;;  %712 = vmatprep.mubr.f32.mxu0 %v395_v19 }
 0x132   : > { %937 = vmatprep.mubr.f32.mxu1 %v397_v20 }
 0x134   : > { %713 = vmatmul.mubr.f32.gmra.mrb[56].mxu0 %v394_v21  ;;  %v418_v21 = vld [vmem:[#allocation2 + $0x38] sm:$0xff] }
 0x135   : > { %938 = vmatmul.mubr.f32.gmra.mrb[56].mxu1 %v396_v22  ;;  %717 = vmatprep.mubr.f32.mxu0 %v399_v23 }
 0x136   : > { %942 = vmatprep.mubr.f32.mxu1 %v401_v24 }
 0x138   : > { %718 = vmatmul.mubr.f32.gmra.mrb[58].mxu0 %v398_v25 }
 0x139   : > { %943 = vmatmul.mubr.f32.gmra.mrb[58].mxu1 %v400_v26  ;;  %722 = vmatprep.mubr.f32.mxu0 %v403_v27 }
 0x13a   : > { %947 = vmatprep.mubr.f32.mxu1 %v405_v28  ;;  %v419_v28 = vld [vmem:[#allocation2 + $0x40] sm:$0xff] }
 0x13c   : > { %723 = vmatmul.mubr.f32.gmra.mrb[60].mxu0 %v402_v29 }
 0x13d   : > { %948 = vmatmul.mubr.f32.gmra.mrb[60].mxu1 %v404_v30  ;;  %727 = vmatprep.mubr.f32.mxu0 %v407_v31 }
 0x13e   : > { %952 = vmatprep.mubr.f32.mxu1 %v409_v32 }
 0x140   : > { %728 = vmatmul.mubr.f32.gmra.mrb[62].mxu0 %v406_v33 }
 0x141   : > { %953 = vmatmul.mubr.f32.gmra.mrb[62].mxu1 %v408_v34 }
 0x197   : > { %v574_v35 = vpop.f32.mrb[0].mxu0 }
 0x198   : > { %v799_v37 = vpop.f32.mrb[0].mxu1  ;;  %v576_v38 = vpop.f32.mrb[1].mxu0 }
 0x199   : > { %v800_v39 = vadd.f32 %v799_v37, %v574_v35  ;;  %v801_v40 = vpop.f32.mrb[1].mxu1  ;;  %v420_v35 = vld [vmem:[#allocation2 + $0x48] sm:$0xff] }
 0x19b   : > { %v958_v41 = vadd.f32 %v800_v39, %v411_v36  ;;  %v579_v42 = vpop.f32.mrb[2].mxu0 }
 0x19c   : > { %v804_v3 = vpop.f32.mrb[2].mxu1  ;;  %v581_v44 = vpop.f32.mrb[3].mxu0 }
 0x19d   : > { %990 = vst [vmem:[#allocation2] sm:$0xff] %v958_v41  ;;  %v805_v45 = vadd.f32 %v804_v3, %v579_v42  ;;  %v806_v46 = vpop.f32.mrb[3].mxu1  ;;  %v421_v42 = vld [vmem:[#allocation2 + $0x50] sm:$0xff] }
 0x19f   : > { %v959_v47 = vadd.f32 %v805_v45, %v412_v43  ;;  %v584_v48 = vpop.f32.mrb[4].mxu0 }
 0x1a0   : > { %v809_v50 = vpop.f32.mrb[4].mxu1  ;;  %v586_v51 = vpop.f32.mrb[5].mxu0 }
 0x1a1   : > { %991 = vst [vmem:[#allocation2 + $0x8] sm:$0xff] %v959_v47  ;;  %v810_v52 = vadd.f32 %v809_v50, %v584_v48  ;;  %v811_v53 = vpop.f32.mrb[5].mxu1  ;;  %v422_v48 = vld [vmem:[#allocation2 + $0x58] sm:$0xff] }
 0x1a3   : > { %v960_v54 = vadd.f32 %v810_v52, %v413_v49  ;;  %v589_v55 = vpop.f32.mrb[6].mxu0 }
 0x1a4   : > { %v814_v57 = vpop.f32.mrb[6].mxu1  ;;  %v591_v58 = vpop.f32.mrb[7].mxu0 }
 0x1a5   : > { %992 = vst [vmem:[#allocation2 + $0x10] sm:$0xff] %v960_v54  ;;  %v815_v59 = vadd.f32 %v814_v57, %v589_v55  ;;  %v816_v60 = vpop.f32.mrb[7].mxu1  ;;  %v423_v55 = vld [vmem:[#allocation2 + $0x60] sm:$0xff] }
 0x1a7   : > { %v961_v61 = vadd.f32 %v815_v59, %v414_v56  ;;  %v594_v62 = vpop.f32.mrb[8].mxu0 }
 0x1a8   : > { %v819_v0 = vpop.f32.mrb[8].mxu1  ;;  %v596_v1 = vpop.f32.mrb[9].mxu0 }
 0x1a9   : > { %993 = vst [vmem:[#allocation2 + $0x18] sm:$0xff] %v961_v61  ;;  %v820_v2 = vadd.f32 %v819_v0, %v594_v62  ;;  %v821_v4 = vpop.f32.mrb[9].mxu1  ;;  %v424_v62 = vld [vmem:[#allocation2 + $0x68] sm:$0xff] }
 0x1ab   : > { %v962_v5 = vadd.f32 %v820_v2, %v415_v63  ;;  %v599_v6 = vpop.f32.mrb[10].mxu0 }
 0x1ac   : > { %v824_v8 = vpop.f32.mrb[10].mxu1  ;;  %v601_v9 = vpop.f32.mrb[11].mxu0 }
 0x1ad   : > { %994 = vst [vmem:[#allocation2 + $0x20] sm:$0xff] %v962_v5  ;;  %v825_v10 = vadd.f32 %v824_v8, %v599_v6  ;;  %v826_v11 = vpop.f32.mrb[11].mxu1  ;;  %v425_v6 = vld [vmem:[#allocation2 + $0x70] sm:$0xff] }
 0x1af   : > { %v963_v12 = vadd.f32 %v825_v10, %v416_v7  ;;  %v604_v13 = vpop.f32.mrb[12].mxu0 }
 0x1b0   : > { %v829_v15 = vpop.f32.mrb[12].mxu1  ;;  %v606_v16 = vpop.f32.mrb[13].mxu0 }
 0x1b1   : > { %995 = vst [vmem:[#allocation2 + $0x28] sm:$0xff] %v963_v12  ;;  %v830_v17 = vadd.f32 %v829_v15, %v604_v13  ;;  %v831_v18 = vpop.f32.mrb[13].mxu1  ;;  %v426_v13 = vld [vmem:[#allocation2 + $0x78] sm:$0xff] }
 0x1b3   : > { %v964_v19 = vadd.f32 %v830_v17, %v417_v14  ;;  %v609_v20 = vpop.f32.mrb[14].mxu0 }
 0x1b4   : > { %v834_v22 = vpop.f32.mrb[14].mxu1  ;;  %v611_v23 = vpop.f32.mrb[15].mxu0 }
 0x1b5   : > { %996 = vst [vmem:[#allocation2 + $0x30] sm:$0xff] %v964_v19  ;;  %v835_v24 = vadd.f32 %v834_v22, %v609_v20  ;;  %v836_v25 = vpop.f32.mrb[15].mxu1  ;;  %v427_v20 = vld [vmem:[#allocation2 + $0x80] sm:$0xff] }
 0x1b7   : > { %v965_v26 = vadd.f32 %v835_v24, %v418_v21  ;;  %v614_v27 = vpop.f32.mrb[16].mxu0 }
 0x1b8   : > { %v839_v29 = vpop.f32.mrb[16].mxu1  ;;  %v616_v30 = vpop.f32.mrb[17].mxu0 }
 0x1b9   : > { %997 = vst [vmem:[#allocation2 + $0x38] sm:$0xff] %v965_v26  ;;  %v840_v31 = vadd.f32 %v839_v29, %v614_v27  ;;  %v841_v32 = vpop.f32.mrb[17].mxu1  ;;  %v428_v27 = vld [vmem:[#allocation2 + $0x88] sm:$0xff] }
 0x1bb   : > { %v966_v33 = vadd.f32 %v840_v31, %v419_v28  ;;  %v619_v34 = vpop.f32.mrb[18].mxu0 }
 0x1bc   : > { %v844_v36 = vpop.f32.mrb[18].mxu1  ;;  %v621_v37 = vpop.f32.mrb[19].mxu0 }
 0x1bd   : > { %998 = vst [vmem:[#allocation2 + $0x40] sm:$0xff] %v966_v33  ;;  %v845_v38 = vadd.f32 %v844_v36, %v619_v34  ;;  %v846_v39 = vpop.f32.mrb[19].mxu1  ;;  %v429_v34 = vld [vmem:[#allocation2 + $0x90] sm:$0xff] }
 0x1bf   : > { %v967_v40 = vadd.f32 %v845_v38, %v420_v35  ;;  %v624_v41 = vpop.f32.mrb[20].mxu0 }
 0x1c0   : > { %v849_v43 = vpop.f32.mrb[20].mxu1  ;;  %v626_v3 = vpop.f32.mrb[21].mxu0 }
 0x1c1   : > { %999 = vst [vmem:[#allocation2 + $0x48] sm:$0xff] %v967_v40  ;;  %v850_v44 = vadd.f32 %v849_v43, %v624_v41  ;;  %v851_v45 = vpop.f32.mrb[21].mxu1  ;;  %v430_v41 = vld [vmem:[#allocation2 + $0x98] sm:$0xff] }
 0x1c3   : > { %v968_v46 = vadd.f32 %v850_v44, %v421_v42  ;;  %v629_v47 = vpop.f32.mrb[22].mxu0 }
 0x1c4   : > { %v854_v49 = vpop.f32.mrb[22].mxu1  ;;  %v631_v50 = vpop.f32.mrb[23].mxu0 }
 0x1c5   : > { %1000 = vst [vmem:[#allocation2 + $0x50] sm:$0xff] %v968_v46  ;;  %v855_v51 = vadd.f32 %v854_v49, %v629_v47  ;;  %v856_v52 = vpop.f32.mrb[23].mxu1  ;;  %v431_v47 = vld [vmem:[#allocation2 + $0xa0] sm:$0xff] }
 0x1c7   : > { %v969_v53 = vadd.f32 %v855_v51, %v422_v48  ;;  %v634_v54 = vpop.f32.mrb[24].mxu0 }
 0x1c8   : > { %v859_v56 = vpop.f32.mrb[24].mxu1  ;;  %v636_v57 = vpop.f32.mrb[25].mxu0 }
 0x1c9   : > { %1001 = vst [vmem:[#allocation2 + $0x58] sm:$0xff] %v969_v53  ;;  %v860_v58 = vadd.f32 %v859_v56, %v634_v54  ;;  %v861_v59 = vpop.f32.mrb[25].mxu1  ;;  %v432_v54 = vld [vmem:[#allocation2 + $0xa8] sm:$0xff] }
 0x1cb   : > { %v970_v60 = vadd.f32 %v860_v58, %v423_v55  ;;  %v639_v61 = vpop.f32.mrb[26].mxu0 }
 0x1cc   : > { %v864_v63 = vpop.f32.mrb[26].mxu1  ;;  %v641_v0 = vpop.f32.mrb[27].mxu0 }
 0x1cd   : > { %1002 = vst [vmem:[#allocation2 + $0x60] sm:$0xff] %v970_v60  ;;  %v865_v1 = vadd.f32 %v864_v63, %v639_v61  ;;  %v866_v2 = vpop.f32.mrb[27].mxu1  ;;  %v433_v61 = vld [vmem:[#allocation2 + $0xb0] sm:$0xff] }
 0x1cf   : > { %v971_v4 = vadd.f32 %v865_v1, %v424_v62  ;;  %v644_v5 = vpop.f32.mrb[28].mxu0 }
 0x1d0   : > { %v869_v7 = vpop.f32.mrb[28].mxu1  ;;  %v646_v8 = vpop.f32.mrb[29].mxu0 }
 0x1d1   : > { %1003 = vst [vmem:[#allocation2 + $0x68] sm:$0xff] %v971_v4  ;;  %v870_v9 = vadd.f32 %v869_v7, %v644_v5  ;;  %v871_v10 = vpop.f32.mrb[29].mxu1  ;;  %v434_v5 = vld [vmem:[#allocation2 + $0xb8] sm:$0xff] }
 0x1d3   : > { %v972_v11 = vadd.f32 %v870_v9, %v425_v6  ;;  %v649_v12 = vpop.f32.mrb[30].mxu0 }
 0x1d4   : > { %v874_v14 = vpop.f32.mrb[30].mxu1  ;;  %v651_v15 = vpop.f32.mrb[31].mxu0 }
 0x1d5   : > { %1004 = vst [vmem:[#allocation2 + $0x70] sm:$0xff] %v972_v11  ;;  %v875_v16 = vadd.f32 %v874_v14, %v649_v12  ;;  %v876_v17 = vpop.f32.mrb[31].mxu1  ;;  %v435_v12 = vld [vmem:[#allocation2 + $0xc0] sm:$0xff] }
 0x1d7   : > { %v973_v18 = vadd.f32 %v875_v16, %v426_v13  ;;  %v654_v19 = vpop.f32.mrb[32].mxu0 }
 0x1d8   : > { %v879_v21 = vpop.f32.mrb[32].mxu1  ;;  %v656_v22 = vpop.f32.mrb[33].mxu0 }
 0x1d9   : > { %1005 = vst [vmem:[#allocation2 + $0x78] sm:$0xff] %v973_v18  ;;  %v880_v23 = vadd.f32 %v879_v21, %v654_v19  ;;  %v881_v24 = vpop.f32.mrb[33].mxu1  ;;  %v436_v19 = vld [vmem:[#allocation2 + $0xc8] sm:$0xff] }
 0x1db   : > { %v974_v25 = vadd.f32 %v880_v23, %v427_v20  ;;  %v659_v26 = vpop.f32.mrb[34].mxu0 }
 0x1dc   : > { %v884_v28 = vpop.f32.mrb[34].mxu1  ;;  %v661_v29 = vpop.f32.mrb[35].mxu0 }
 0x1dd   : > { %1006 = vst [vmem:[#allocation2 + $0x80] sm:$0xff] %v974_v25  ;;  %v885_v30 = vadd.f32 %v884_v28, %v659_v26  ;;  %v886_v31 = vpop.f32.mrb[35].mxu1  ;;  %v437_v26 = vld [vmem:[#allocation2 + $0xd0] sm:$0xff] }
 0x1df   : > { %v975_v32 = vadd.f32 %v885_v30, %v428_v27  ;;  %v664_v33 = vpop.f32.mrb[36].mxu0 }
 0x1e0   : > { %v889_v35 = vpop.f32.mrb[36].mxu1  ;;  %v666_v36 = vpop.f32.mrb[37].mxu0 }
 0x1e1   : > { %1007 = vst [vmem:[#allocation2 + $0x88] sm:$0xff] %v975_v32  ;;  %v890_v37 = vadd.f32 %v889_v35, %v664_v33  ;;  %v891_v38 = vpop.f32.mrb[37].mxu1  ;;  %v438_v33 = vld [vmem:[#allocation2 + $0xd8] sm:$0xff] }
 0x1e3   : > { %v976_v39 = vadd.f32 %v890_v37, %v429_v34  ;;  %v669_v40 = vpop.f32.mrb[38].mxu0 }
 0x1e4   : > { %v894_v42 = vpop.f32.mrb[38].mxu1  ;;  %v671_v43 = vpop.f32.mrb[39].mxu0 }
 0x1e5   : > { %1008 = vst [vmem:[#allocation2 + $0x90] sm:$0xff] %v976_v39  ;;  %v895_v3 = vadd.f32 %v894_v42, %v669_v40  ;;  %v896_v44 = vpop.f32.mrb[39].mxu1  ;;  %v439_v40 = vld [vmem:[#allocation2 + $0xe0] sm:$0xff] }
 0x1e7   : > { %v977_v45 = vadd.f32 %v895_v3, %v430_v41  ;;  %v674_v46 = vpop.f32.mrb[40].mxu0 }
 0x1e8   : > { %v899_v48 = vpop.f32.mrb[40].mxu1  ;;  %v676_v49 = vpop.f32.mrb[41].mxu0 }
 0x1e9   : > { %1009 = vst [vmem:[#allocation2 + $0x98] sm:$0xff] %v977_v45  ;;  %v900_v50 = vadd.f32 %v899_v48, %v674_v46  ;;  %v901_v51 = vpop.f32.mrb[41].mxu1  ;;  %v440_v46 = vld [vmem:[#allocation2 + $0xe8] sm:$0xff] }
 0x1eb   : > { %v978_v52 = vadd.f32 %v900_v50, %v431_v47  ;;  %v679_v53 = vpop.f32.mrb[42].mxu0 }
 0x1ec   : > { %v904_v55 = vpop.f32.mrb[42].mxu1  ;;  %v681_v56 = vpop.f32.mrb[43].mxu0 }
 0x1ed   : > { %1010 = vst [vmem:[#allocation2 + $0xa0] sm:$0xff] %v978_v52  ;;  %v905_v57 = vadd.f32 %v904_v55, %v679_v53  ;;  %v906_v58 = vpop.f32.mrb[43].mxu1  ;;  %v441_v53 = vld [vmem:[#allocation2 + $0xf0] sm:$0xff] }
 0x1ef   : > { %v979_v59 = vadd.f32 %v905_v57, %v432_v54  ;;  %v684_v60 = vpop.f32.mrb[44].mxu0 }
 0x1f0   : > { %v909_v62 = vpop.f32.mrb[44].mxu1  ;;  %v686_v63 = vpop.f32.mrb[45].mxu0 }
 0x1f1   : > { %1011 = vst [vmem:[#allocation2 + $0xa8] sm:$0xff] %v979_v59  ;;  %v910_v0 = vadd.f32 %v909_v62, %v684_v60  ;;  %v911_v1 = vpop.f32.mrb[45].mxu1  ;;  %v442_v60 = vld [vmem:[#allocation2 + $0xf8] sm:$0xff] }
 0x1f3   : > { %v980_v2 = vadd.f32 %v910_v0, %v433_v61  ;;  %v689_v4 = vpop.f32.mrb[46].mxu0 }
 0x1f4   : > { %v914_v6 = vpop.f32.mrb[46].mxu1  ;;  %v691_v7 = vpop.f32.mrb[47].mxu0 }
 0x1f5   : > { %1012 = vst [vmem:[#allocation2 + $0xb0] sm:$0xff] %v980_v2  ;;  %v915_v8 = vadd.f32 %v914_v6, %v689_v4  ;;  %v916_v9 = vpop.f32.mrb[47].mxu1  ;;  %v1060_v2 = vld [vmem:[%s2140_s29 + $0x10] sm:$0xff] (!%p1489_p2)  ;;  %v1058_v4 = vld [vmem:[%s2140_s29] sm:$0xff] (!%p1489_p2)  ;;  %v1061_v6 = vld [vmem:[%s2140_s29 + $0x18] sm:$0xff] (!%p1489_p2) }
 0x1f6   : > { %v1059_v7 = vld [vmem:[%s2140_s29 + $0x8] sm:$0xff] (!%p1489_p2)  ;;  %v1062_v9 = vld [vmem:[%s2140_s29 + $0x20] sm:$0xff] (!%p1489_p2) }
 0x1f7   : > { %v981_v10 = vadd.f32 %v915_v8, %v434_v5  ;;  %v694_v11 = vpop.f32.mrb[48].mxu0  ;;  %v1913_v5 = vmov (!%p1489_p2), 0   ;;  %v1063_v8 = vld [vmem:[%s2140_s29 + $0x28] sm:$0xff] (!%p1489_p2) }
 0x1f8   : > { %v919_v13 = vpop.f32.mrb[48].mxu1  ;;  %v696_v14 = vpop.f32.mrb[49].mxu0  ;;  %1717 = vset.pattern.permute.xlu1 (!%p1489_p2), %v1913_v5  ;;  %1716 = vset.pattern.permute.xlu0 (!%p1489_p2), %v1913_v5 }
 0x1f9   : > { %1013 = vst [vmem:[#allocation2 + $0xb8] sm:$0xff] %v981_v10  ;;  %v920_v15 = vadd.f32 %v919_v13, %v694_v11  ;;  %v921_v16 = vpop.f32.mrb[49].mxu1  ;;  %1102 = vperm.xlu1 (!%p1489_p2), %1717, %v1060_v2   ;;  %1092 = vperm.xlu0 (!%p1489_p2), %1716, %v1058_v4   ;;  %v1065_v10 = vld [vmem:[%s2140_s29 + $0x38] sm:$0xff] (!%p1489_p2)  ;;  %v1064_v11 = vld [vmem:[%s2140_s29 + $0x30] sm:$0xff] (!%p1489_p2)  ;;  %v1066_v13 = vld [vmem:[%s2140_s29 + $0x40] sm:$0xff] (!%p1489_p2) }
 0x1fa   : > { %v1069_v14 = vld [vmem:[%s2140_s29 + $0x58] sm:$0xff] (!%p1489_p2)  ;;  %v1071_v16 = vld [vmem:[%s2140_s29 + $0x68] sm:$0xff] (!%p1489_p2)  ;;  %v1034_v2 = vld [vmem:[#allocation2 + $0x40] sm:$0xff] (!%p1489_p2) }
 0x1fb   : > { %v982_v17 = vadd.f32 %v920_v15, %v435_v12  ;;  %v699_v18 = vpop.f32.mrb[50].mxu0  ;;  %v1067_v12 = vld [vmem:[%s2140_s29 + $0x48] sm:$0xff] (!%p1489_p2)  ;;  %v1068_v15 = vld [vmem:[%s2140_s29 + $0x50] sm:$0xff] (!%p1489_p2) }
 0x1fc   : > { %v924_v20 = vpop.f32.mrb[50].mxu1  ;;  %v701_v21 = vpop.f32.mrb[51].mxu0 }
 0x1fd   : > { %1014 = vst [vmem:[#allocation2 + $0xc0] sm:$0xff] %v982_v17  ;;  %v925_v22 = vadd.f32 %v924_v20, %v699_v18  ;;  %v926_v23 = vpop.f32.mrb[51].mxu1  ;;  %1107 = vperm.xlu1 (!%p1489_p2), %1717, %v1061_v6   ;;  %1097 = vperm.xlu0 (!%p1489_p2), %1716, %v1059_v7   ;;  %v1070_v17 = vld [vmem:[%s2140_s29 + $0x60] sm:$0xff] (!%p1489_p2)  ;;  %v1073_v18 = vld [vmem:[%s2140_s29 + $0x78] sm:$0xff] (!%p1489_p2)  ;;  %v1075_v20 = vld [vmem:[%s2140_s29 + $0x88] sm:$0xff] (!%p1489_p2) }
 0x1fe   : > { %v1074_v21 = vld [vmem:[%s2140_s29 + $0x80] sm:$0xff] (!%p1489_p2)  ;;  %v1076_v23 = vld [vmem:[%s2140_s29 + $0x90] sm:$0xff] (!%p1489_p2) }
 0x1ff   : > { %v983_v24 = vadd.f32 %v925_v22, %v436_v19  ;;  %v704_v25 = vpop.f32.mrb[52].mxu0  ;;  %v1072_v19 = vld [vmem:[%s2140_s29 + $0x70] sm:$0xff] (!%p1489_p2)  ;;  %v1077_v22 = vld [vmem:[%s2140_s29 + $0x98] sm:$0xff] (!%p1489_p2) }
 0x200   : > { %v929_v27 = vpop.f32.mrb[52].mxu1  ;;  %v706_v28 = vpop.f32.mrb[53].mxu0 }
 0x201   : > { %1015 = vst [vmem:[#allocation2 + $0xc8] sm:$0xff] %v983_v24  ;;  %v930_v29 = vadd.f32 %v929_v27, %v704_v25  ;;  %v931_v30 = vpop.f32.mrb[53].mxu1  ;;  %1117 = vperm.xlu1 (!%p1489_p2), %1717, %v1063_v8   ;;  %1112 = vperm.xlu0 (!%p1489_p2), %1716, %v1062_v9   ;;  %v1079_v24 = vld [vmem:[%s2140_s29 + $0xa8] sm:$0xff] (!%p1489_p2)  ;;  %v1078_v25 = vld [vmem:[%s2140_s29 + $0xa0] sm:$0xff] (!%p1489_p2)  ;;  %v1080_v27 = vld [vmem:[%s2140_s29 + $0xb0] sm:$0xff] (!%p1489_p2) }
 0x202   : > { %v1083_v28 = vld [vmem:[%s2140_s29 + $0xc8] sm:$0xff] (!%p1489_p2)  ;;  %v1085_v30 = vld [vmem:[%s2140_s29 + $0xd8] sm:$0xff] (!%p1489_p2) }
 0x203   : > { %v984_v31 = vadd.f32 %v930_v29, %v437_v26  ;;  %v709_v32 = vpop.f32.mrb[54].mxu0  ;;  %v1081_v26 = vld [vmem:[%s2140_s29 + $0xb8] sm:$0xff] (!%p1489_p2)  ;;  %v1082_v29 = vld [vmem:[%s2140_s29 + $0xc0] sm:$0xff] (!%p1489_p2) }
 0x204   : > { %v934_v34 = vpop.f32.mrb[54].mxu1  ;;  %v711_v35 = vpop.f32.mrb[55].mxu0 }
 0x205   : > { %1016 = vst [vmem:[#allocation2 + $0xd0] sm:$0xff] %v984_v31  ;;  %v935_v36 = vadd.f32 %v934_v34, %v709_v32  ;;  %v936_v37 = vpop.f32.mrb[55].mxu1  ;;  %1127 = vperm.xlu1 (!%p1489_p2), %1717, %v1065_v10   ;;  %1122 = vperm.xlu0 (!%p1489_p2), %1716, %v1064_v11   ;;  %v1084_v31 = vld [vmem:[%s2140_s29 + $0xd0] sm:$0xff] (!%p1489_p2)  ;;  %v1087_v32 = vld [vmem:[%s2140_s29 + $0xe8] sm:$0xff] (!%p1489_p2)  ;;  %v1089_v34 = vld [vmem:[%s2140_s29 + $0xf8] sm:$0xff] (!%p1489_p2) }
 0x206   : > { %v1088_v35 = vld [vmem:[%s2140_s29 + $0xf0] sm:$0xff] (!%p1489_p2)  ;;  %v1026_v37 = vld [vmem:[#allocation2] sm:$0xff] (!%p1489_p2)  ;;  %v1037_v10 = vld [vmem:[#allocation2 + $0x58] sm:$0xff] (!%p1489_p2) }
 0x207   : > { %v985_v38 = vadd.f32 %v935_v36, %v438_v33  ;;  %v714_v39 = vpop.f32.mrb[56].mxu0  ;;  %v1086_v33 = vld [vmem:[%s2140_s29 + $0xe0] sm:$0xff] (!%p1489_p2)  ;;  %v1028_v36 = vld [vmem:[#allocation2 + $0x10] sm:$0xff] (!%p1489_p2) }
 0x208   : > { %v939_v41 = vpop.f32.mrb[56].mxu1  ;;  %v716_v42 = vpop.f32.mrb[57].mxu0  ;;  %v1036_v11 = vld [vmem:[#allocation2 + $0x50] sm:$0xff] (!%p1489_p2) }
 0x209   : > { %1017 = vst [vmem:[#allocation2 + $0xd8] sm:$0xff] %v985_v38  ;;  %v940_v43 = vadd.f32 %v939_v41, %v714_v39  ;;  %v941_v3 = vpop.f32.mrb[57].mxu1  ;;  %1137 = vperm.xlu1 (!%p1489_p2), %1717, %v1067_v12   ;;  %1132 = vperm.xlu0 (!%p1489_p2), %1716, %v1066_v13   ;;  %v1029_v42 = vld [vmem:[#allocation2 + $0x18] sm:$0xff] (!%p1489_p2) }
 0x20b   : > { %v986_v44 = vadd.f32 %v940_v43, %v439_v40  ;;  %v719_v45 = vpop.f32.mrb[58].mxu0  ;;  %v1027_v43 = vld [vmem:[#allocation2 + $0x8] sm:$0xff] (!%p1489_p2) }
 0x20c   : > { %v944_v47 = vpop.f32.mrb[58].mxu1  ;;  %v721_v48 = vpop.f32.mrb[59].mxu0 }
 0x20d   : > { %1018 = vst [vmem:[#allocation2 + $0xe0] sm:$0xff] %v986_v44  ;;  %v945_v49 = vadd.f32 %v944_v47, %v719_v45  ;;  %v946_v50 = vpop.f32.mrb[59].mxu1  ;;  %1147 = vperm.xlu1 (!%p1489_p2), %1717, %v1069_v14   ;;  %1142 = vperm.xlu0 (!%p1489_p2), %1716, %v1068_v15  }
 0x20e   : > { %v1030_v50 = vld [vmem:[#allocation2 + $0x20] sm:$0xff] (!%p1489_p2) }
 0x20f   : > { %v987_v51 = vadd.f32 %v945_v49, %v440_v46  ;;  %v724_v52 = vpop.f32.mrb[60].mxu0  ;;  %v1031_v49 = vld [vmem:[#allocation2 + $0x28] sm:$0xff] (!%p1489_p2) }
 0x210   : > { %v949_v54 = vpop.f32.mrb[60].mxu1  ;;  %v726_v55 = vpop.f32.mrb[61].mxu0 }
 0x211   : > { %1019 = vst [vmem:[#allocation2 + $0xe8] sm:$0xff] %v987_v51  ;;  %v950_v56 = vadd.f32 %v949_v54, %v724_v52  ;;  %v951_v57 = vpop.f32.mrb[61].mxu1  ;;  %1157 = vperm.xlu1 (!%p1489_p2), %1717, %v1071_v16   ;;  %1152 = vperm.xlu0 (!%p1489_p2), %1716, %v1070_v17  }
 0x212   : > { %v1033_v57 = vld [vmem:[#allocation2 + $0x38] sm:$0xff] (!%p1489_p2) }
 0x213   : > { %v988_v58 = vadd.f32 %v950_v56, %v441_v53  ;;  %v729_v59 = vpop.f32.mrb[62].mxu0  ;;  %1025 = sbr.rel (%p1489_p2) target bundleno = 698 (0x2ba), region = 48 }
 0x214   : > { %v954_v61 = vpop.f32.mrb[62].mxu1  ;;  %v731_v62 = vpop.f32.mrb[63].mxu0 }
 0x215   : > { %1020 = vst [vmem:[#allocation2 + $0xf0] sm:$0xff] %v988_v58  ;;  %v955_v63 = vadd.f32 %v954_v61, %v729_v59  ;;  %v956_v0 = vpop.f32.mrb[63].mxu1  ;;  %1167 = vperm.xlu1 (!%p1489_p2), %1717, %v1073_v18   ;;  %1162 = vperm.xlu0 (!%p1489_p2), %1716, %v1072_v19   ;;  %v1032_v58 = vld [vmem:[#allocation2 + $0x30] sm:$0xff] (!%p1489_p2)  ;;  %v1039_v18 = vld [vmem:[#allocation2 + $0x68] sm:$0xff] (!%p1489_p2)  ;;  %v1038_v19 = vld [vmem:[#allocation2 + $0x60] sm:$0xff] (!%p1489_p2) }
 0x217   : > { %v989_v1 = vadd.f32 %v955_v63, %v442_v60 }
 0x219   : > { %1021 = vst [vmem:[#allocation2 + $0xf8] sm:$0xff] %v989_v1  ;;  %1177 = vperm.xlu1 (!%p1489_p2), %1717, %v1075_v20   ;;  %1172 = vperm.xlu0 (!%p1489_p2), %1716, %v1074_v21   ;;  %v1035_v1 = vld [vmem:[#allocation2 + $0x48] sm:$0xff] (!%p1489_p2) }
 0x21d   : > { %1187 = vperm.xlu1 %1717, %v1077_v22   ;;  %1182 = vperm.xlu0 %1716, %v1076_v23  }
 0x221   : > { %1197 = vperm.xlu1 %1717, %v1079_v24   ;;  %1192 = vperm.xlu0 %1716, %v1078_v25  }
 0x225   : > { %1207 = vperm.xlu1 %1717, %v1081_v26   ;;  %1202 = vperm.xlu0 %1716, %v1080_v27   ;;  %v1041_v26 = vld [vmem:[#allocation2 + $0x78] sm:$0xff]  ;;  %v1040_v27 = vld [vmem:[#allocation2 + $0x70] sm:$0xff] }
 0x229   : > { %1217 = vperm.xlu1 %1717, %v1083_v28   ;;  %1212 = vperm.xlu0 %1716, %v1082_v29  }
 0x22d   : > { %1227 = vperm.xlu1 %1717, %v1085_v30   ;;  %1222 = vperm.xlu0 %1716, %v1084_v31  }
 0x231   : > { %1237 = vperm.xlu1 %1717, %v1087_v32   ;;  %1232 = vperm.xlu0 %1716, %v1086_v33  }
 0x235   : > { %1247 = vperm.xlu1 %1717, %v1089_v34   ;;  %1242 = vperm.xlu0 %1716, %v1088_v35   ;;  %v1043_v34 = vld [vmem:[#allocation2 + $0x88] sm:$0xff]  ;;  %v1042_v35 = vld [vmem:[#allocation2 + $0x80] sm:$0xff] }
 0x278   : > { %v1103_v38 = vpop.permute.xlu1 %1102  ;;  %v1093_v39 = vpop.permute.xlu0 %1092 }
 0x279   : > { %v1252_v40 = vmul.f32 %v1103_v38, %v1028_v36  ;;  %v1250_v41 = vmul.f32 %v1093_v39, %v1026_v37 }
 0x27b   : > { %v1284_v3 = vmax.f32 %v1252_v40, 0.0  ;;  %v1282_v44 = vmax.f32 %v1250_v41, 0.0 }
 0x27c   : > { %v1108_v45 = vpop.permute.xlu1 %1107  ;;  %v1098_v46 = vpop.permute.xlu0 %1097 }
 0x27d   : > { %1316 = vst [vmem:[%s2142_s28 + $0x10] sm:$0xff] %v1284_v3  ;;  %1314 = vst [vmem:[%s2142_s28] sm:$0xff] %v1282_v44  ;;  %v1253_v47 = vmul.f32 %v1108_v45, %v1029_v42  ;;  %v1251_v48 = vmul.f32 %v1098_v46, %v1027_v43  ;;  %v1045_v42 = vld [vmem:[#allocation2 + $0x98] sm:$0xff]  ;;  %v1044_v43 = vld [vmem:[#allocation2 + $0x90] sm:$0xff] }
 0x27f   : > { %v1285_v51 = vmax.f32 %v1253_v47, 0.0  ;;  %v1283_v52 = vmax.f32 %v1251_v48, 0.0 }
 0x280   : > { %v1118_v53 = vpop.permute.xlu1 %1117  ;;  %v1113_v54 = vpop.permute.xlu0 %1112 }
 0x281   : > { %1317 = vst [vmem:[%s2142_s28 + $0x18] sm:$0xff] %v1285_v51  ;;  %1315 = vst [vmem:[%s2142_s28 + $0x8] sm:$0xff] %v1283_v52  ;;  %v1255_v55 = vmul.f32 %v1118_v53, %v1031_v49  ;;  %v1254_v56 = vmul.f32 %v1113_v54, %v1030_v50  ;;  %v1047_v49 = vld [vmem:[#allocation2 + $0xa8] sm:$0xff]  ;;  %v1046_v50 = vld [vmem:[#allocation2 + $0xa0] sm:$0xff] }
 0x283   : > { %v1287_v59 = vmax.f32 %v1255_v55, 0.0  ;;  %v1286_v60 = vmax.f32 %v1254_v56, 0.0 }
 0x284   : > { %v1128_v61 = vpop.permute.xlu1 %1127  ;;  %v1123_v62 = vpop.permute.xlu0 %1122 }
 0x285   : > { %1319 = vst [vmem:[%s2142_s28 + $0x28] sm:$0xff] %v1287_v59  ;;  %1318 = vst [vmem:[%s2142_s28 + $0x20] sm:$0xff] %v1286_v60  ;;  %v1257_v63 = vmul.f32 %v1128_v61, %v1033_v57  ;;  %v1256_v0 = vmul.f32 %v1123_v62, %v1032_v58  ;;  %v1049_v57 = vld [vmem:[#allocation2 + $0xb8] sm:$0xff]  ;;  %v1048_v58 = vld [vmem:[#allocation2 + $0xb0] sm:$0xff] }
 0x287   : > { %v1289_v4 = vmax.f32 %v1257_v63, 0.0  ;;  %v1288_v5 = vmax.f32 %v1256_v0, 0.0 }
 0x288   : > { %v1138_v6 = vpop.permute.xlu1 %1137  ;;  %v1133_v7 = vpop.permute.xlu0 %1132 }
 0x289   : > { %1321 = vst [vmem:[%s2142_s28 + $0x38] sm:$0xff] %v1289_v4  ;;  %1320 = vst [vmem:[%s2142_s28 + $0x30] sm:$0xff] %v1288_v5  ;;  %v1259_v8 = vmul.f32 %v1138_v6, %v1035_v1  ;;  %v1258_v9 = vmul.f32 %v1133_v7, %v1034_v2  ;;  %v1051_v1 = vld [vmem:[#allocation2 + $0xc8] sm:$0xff]  ;;  %v1050_v2 = vld [vmem:[#allocation2 + $0xc0] sm:$0xff] }
 0x28b   : > { %v1291_v12 = vmax.f32 %v1259_v8, 0.0  ;;  %v1290_v13 = vmax.f32 %v1258_v9, 0.0 }
 0x28c   : > { %v1148_v14 = vpop.permute.xlu1 %1147  ;;  %v1143_v15 = vpop.permute.xlu0 %1142 }
 0x28d   : > { %1323 = vst [vmem:[%s2142_s28 + $0x48] sm:$0xff] %v1291_v12  ;;  %1322 = vst [vmem:[%s2142_s28 + $0x40] sm:$0xff] %v1290_v13  ;;  %v1261_v16 = vmul.f32 %v1148_v14, %v1037_v10  ;;  %v1260_v17 = vmul.f32 %v1143_v15, %v1036_v11  ;;  %v1053_v10 = vld [vmem:[#allocation2 + $0xd8] sm:$0xff]  ;;  %v1052_v11 = vld [vmem:[#allocation2 + $0xd0] sm:$0xff] }
 0x28f   : > { %v1293_v20 = vmax.f32 %v1261_v16, 0.0  ;;  %v1292_v21 = vmax.f32 %v1260_v17, 0.0 }
 0x290   : > { %v1158_v22 = vpop.permute.xlu1 %1157  ;;  %v1153_v23 = vpop.permute.xlu0 %1152 }
 0x291   : > { %1325 = vst [vmem:[%s2142_s28 + $0x58] sm:$0xff] %v1293_v20  ;;  %1324 = vst [vmem:[%s2142_s28 + $0x50] sm:$0xff] %v1292_v21  ;;  %v1263_v24 = vmul.f32 %v1158_v22, %v1039_v18  ;;  %v1262_v25 = vmul.f32 %v1153_v23, %v1038_v19  ;;  %v1055_v18 = vld [vmem:[#allocation2 + $0xe8] sm:$0xff]  ;;  %v1054_v19 = vld [vmem:[#allocation2 + $0xe0] sm:$0xff] }
 0x293   : > { %v1295_v28 = vmax.f32 %v1263_v24, 0.0  ;;  %v1294_v29 = vmax.f32 %v1262_v25, 0.0 }
 0x294   : > { %v1168_v30 = vpop.permute.xlu1 %1167  ;;  %v1163_v31 = vpop.permute.xlu0 %1162 }
 0x295   : > { %1327 = vst [vmem:[%s2142_s28 + $0x68] sm:$0xff] %v1295_v28  ;;  %1326 = vst [vmem:[%s2142_s28 + $0x60] sm:$0xff] %v1294_v29  ;;  %v1265_v32 = vmul.f32 %v1168_v30, %v1041_v26  ;;  %v1264_v33 = vmul.f32 %v1163_v31, %v1040_v27  ;;  %v1057_v26 = vld [vmem:[#allocation2 + $0xf8] sm:$0xff]  ;;  %v1056_v27 = vld [vmem:[#allocation2 + $0xf0] sm:$0xff] }
 0x297   : > { %v1297_v36 = vmax.f32 %v1265_v32, 0.0  ;;  %v1296_v37 = vmax.f32 %v1264_v33, 0.0 }
 0x298   : > { %v1178_v38 = vpop.permute.xlu1 %1177  ;;  %v1173_v39 = vpop.permute.xlu0 %1172 }
 0x299   : > { %1329 = vst [vmem:[%s2142_s28 + $0x78] sm:$0xff] %v1297_v36  ;;  %1328 = vst [vmem:[%s2142_s28 + $0x70] sm:$0xff] %v1296_v37  ;;  %v1267_v40 = vmul.f32 %v1178_v38, %v1043_v34  ;;  %v1266_v41 = vmul.f32 %v1173_v39, %v1042_v35 }
 0x29b   : > { %v1299_v3 = vmax.f32 %v1267_v40, 0.0  ;;  %v1298_v44 = vmax.f32 %v1266_v41, 0.0 }
 0x29c   : > { %v1188_v45 = vpop.permute.xlu1 %1187  ;;  %v1183_v46 = vpop.permute.xlu0 %1182 }
 0x29d   : > { %1331 = vst [vmem:[%s2142_s28 + $0x88] sm:$0xff] %v1299_v3  ;;  %1330 = vst [vmem:[%s2142_s28 + $0x80] sm:$0xff] %v1298_v44  ;;  %v1269_v47 = vmul.f32 %v1188_v45, %v1045_v42  ;;  %v1268_v48 = vmul.f32 %v1183_v46, %v1044_v43 }
 0x29f   : > { %v1301_v51 = vmax.f32 %v1269_v47, 0.0  ;;  %v1300_v52 = vmax.f32 %v1268_v48, 0.0 }
 0x2a0   : > { %v1198_v53 = vpop.permute.xlu1 %1197  ;;  %v1193_v54 = vpop.permute.xlu0 %1192 }
 0x2a1   : > { %1333 = vst [vmem:[%s2142_s28 + $0x98] sm:$0xff] %v1301_v51  ;;  %1332 = vst [vmem:[%s2142_s28 + $0x90] sm:$0xff] %v1300_v52  ;;  %v1271_v55 = vmul.f32 %v1198_v53, %v1047_v49  ;;  %v1270_v56 = vmul.f32 %v1193_v54, %v1046_v50 }
 0x2a3   : > { %v1303_v59 = vmax.f32 %v1271_v55, 0.0  ;;  %v1302_v60 = vmax.f32 %v1270_v56, 0.0 }
 0x2a4   : > { %v1208_v61 = vpop.permute.xlu1 %1207  ;;  %v1203_v62 = vpop.permute.xlu0 %1202 }
 0x2a5   : > { %1335 = vst [vmem:[%s2142_s28 + $0xa8] sm:$0xff] %v1303_v59  ;;  %1334 = vst [vmem:[%s2142_s28 + $0xa0] sm:$0xff] %v1302_v60  ;;  %v1273_v63 = vmul.f32 %v1208_v61, %v1049_v57  ;;  %v1272_v0 = vmul.f32 %v1203_v62, %v1048_v58 }
 0x2a7   : > { %v1305_v4 = vmax.f32 %v1273_v63, 0.0  ;;  %v1304_v5 = vmax.f32 %v1272_v0, 0.0 }
 0x2a8   : > { %v1218_v6 = vpop.permute.xlu1 %1217  ;;  %v1213_v7 = vpop.permute.xlu0 %1212 }
 0x2a9   : > { %1337 = vst [vmem:[%s2142_s28 + $0xb8] sm:$0xff] %v1305_v4  ;;  %1336 = vst [vmem:[%s2142_s28 + $0xb0] sm:$0xff] %v1304_v5  ;;  %v1275_v8 = vmul.f32 %v1218_v6, %v1051_v1  ;;  %v1274_v9 = vmul.f32 %v1213_v7, %v1050_v2 }
 0x2ab   : > { %v1307_v12 = vmax.f32 %v1275_v8, 0.0  ;;  %v1306_v13 = vmax.f32 %v1274_v9, 0.0 }
 0x2ac   : > { %v1228_v14 = vpop.permute.xlu1 %1227  ;;  %v1223_v15 = vpop.permute.xlu0 %1222 }
 0x2ad   : > { %1339 = vst [vmem:[%s2142_s28 + $0xc8] sm:$0xff] %v1307_v12  ;;  %1338 = vst [vmem:[%s2142_s28 + $0xc0] sm:$0xff] %v1306_v13  ;;  %v1277_v16 = vmul.f32 %v1228_v14, %v1053_v10  ;;  %v1276_v17 = vmul.f32 %v1223_v15, %v1052_v11 }
 0x2af   : > { %v1309_v20 = vmax.f32 %v1277_v16, 0.0  ;;  %v1308_v21 = vmax.f32 %v1276_v17, 0.0 }
 0x2b0   : > { %v1238_v22 = vpop.permute.xlu1 %1237  ;;  %v1233_v23 = vpop.permute.xlu0 %1232 }
 0x2b1   : > { %1341 = vst [vmem:[%s2142_s28 + $0xd8] sm:$0xff] %v1309_v20  ;;  %1340 = vst [vmem:[%s2142_s28 + $0xd0] sm:$0xff] %v1308_v21  ;;  %v1279_v24 = vmul.f32 %v1238_v22, %v1055_v18  ;;  %v1278_v25 = vmul.f32 %v1233_v23, %v1054_v19 }
 0x2b3   : > { %v1311_v28 = vmax.f32 %v1279_v24, 0.0  ;;  %v1310_v29 = vmax.f32 %v1278_v25, 0.0 }
 0x2b4   : > { %v1248_v30 = vpop.permute.xlu1 %1247  ;;  %v1243_v31 = vpop.permute.xlu0 %1242 }
 0x2b5   : > { %1343 = vst [vmem:[%s2142_s28 + $0xe8] sm:$0xff] %v1311_v28  ;;  %1342 = vst [vmem:[%s2142_s28 + $0xe0] sm:$0xff] %v1310_v29  ;;  %v1281_v32 = vmul.f32 %v1248_v30, %v1057_v26  ;;  %v1280_v33 = vmul.f32 %v1243_v31, %v1056_v27 }
 0x2b7   : > { %v1313_v34 = vmax.f32 %v1281_v32, 0.0  ;;  %v1312_v35 = vmax.f32 %v1280_v33, 0.0 }
 0x2b9   : > { %1345 = vst [vmem:[%s2142_s28 + $0xf8] sm:$0xff] %v1313_v34  ;;  %1344 = vst [vmem:[%s2142_s28 + $0xf0] sm:$0xff] %v1312_v35 }
 0x2ba PF: > { %s1496_s18 = sshll.u32 %s1890_s19, 12  ;;  %s1360_s23 = sshll.u32 %s2142_s28, 4  ;;  %s2444_s23 = int_to_ptr.vmem [resolvable:$true] %s1360_s23 }
 0x2bb   : > { %s2441_s12 = scalar_lea.hbm %s2512_s3, %s1496_s18  ;;  %s2448_s10 = scalar_lea.sflag [#allocation5], %s234_s20 }
 0x2bc   : > { %s1776_s25 = scalar_lea.vmem %s2444_s23, 4096  ;;  %p2545_p6 = scmp.ne.s32.totalorder %s2530_s30, 0 }
 0x2bd   : > { %p1777_p3 = scmp.ne.s32.totalorder %s2444_s23, %s1776_s25  ;;  %s1914_s19 = smov [#allocation8]  }
 0x2be   : > { %s1780_s6 = sshll.u32 %s1914_s19, 4  ;;  %s1781_s6 = int_to_ptr.vmem [resolvable:$false] %s1780_s6 }
 0x2bf   : > { %p1778_p10 = pnand %p1777_p3, %p2545_p6  ;;  %s1782_s5 = scalar_lea.vmem %s1781_s6, 8192 }
 0x2c0   : > { %p1783_p0 = scmp.lt.s32.totalorder %s2444_s23, %s1781_s6  ;;  %p1784_p8 = scmp.lt.s32.totalorder %s1782_s5, %s1776_s25 }
 0x2c1   : > { %p1779_p12 = pneg %p1778_p10 }
 0x2c2   : > { %p1785_p11 = por %p1784_p8, %p1783_p0 }
 0x2c4   : > { %p1786_p13 = pnand %p1785_p11, %p1779_p12 }
 0x2c6   : > { %1789 = shalt.err (!%p1786_p13)
}
 0x2c7   : > { %s1790_s20 = scalar_lea.hbm %s2441_s12, 4096  ;;  %s1794_s7 = scalar_lea.hbm %s2512_s3, 12288 }
 0x2c8   : > { %p1791_p7 = scmp.ne.s32.totalorder %s2441_s12, %s1790_s20  ;;  %p1795_p5 = scmp.lt.u32.totalorder %s2441_s12, %s2512_s3 }
 0x2c9   : > { %p1796_p4 = scmp.lt.u32.totalorder %s1794_s7, %s1790_s20  ;;  %p1798_p3 = scmp.lt.u32.totalorder %s1790_s20, %s2441_s12 }
 0x2ca   : > { %p1792_p9 = pnand %p1791_p7, %p2545_p6 }
 0x2cb   : > { %p1797_p2 = por %p1796_p4, %p1795_p5 }
 0x2cc   : > { %p1793_p1 = pneg %p1792_p9 }
 0x2cd   : > { %p1799_p10 = por %p1798_p3, %p1797_p2 }
 0x2cf   : > { %p1800_p12 = pnand %p1799_p10, %p1793_p1 }
 0x2d1   : > { %1803 = shalt.err (!%p1800_p12)
}
 0x2d2   : > { %s1915_s28 = smov 128   ;;  %s1916_s26 = smov 8  }
 0x2d3   : > { %1599 = dma.vmem_to_hbm [thread:$0]  (%p2545_p6), %s2444_s23, 4096, %s2441_s12, %s2448_s10, %s1915_s28, %s1915_s28, %s1916_s26  }
 0x2d4 PF: > { %s2546_s4 = sld [smem:[#allocation12_spill]]  ;;  %s2547_s18 = sld [smem:[#allocation14_spill]] }
 0x2d5   : > { %p1616_p0 = scmp.ge.s32.totalorder %s1902_s22, 2 }
 0x2da   : > { %s1375_s27 = sand.u32 1, %s2546_s4   ;;  %p2548_p8 = scmp.ne.s32.totalorder %s2547_s18, 0 }
 0x2db   : > { %s1376_s1 = scalar_lea.sflag [#allocation5], %s1375_s27 }
 0x2dc   : > { %p1610_p11 = pnand %p1616_p0, %p2548_p8 }
 0x2de   : > { %1857 = dma.done.wait (!%p1610_p11), %s1376_s1, 4096  }
 0x2df   : > { %1859 = vsyncadd (!%p1610_p11), %s1376_s1, 4294963200  ;;  %s20_s22 = sadd.s32 1, %s1902_s22   ;;  %s2549_s18 = sld [smem:[#allocation13_spill]] }
 0x2e0   : > { %p17_p13 = scmp.ge.s32.totalorder %s20_s22, 8   ;;  %s2550_s20 = sld [smem:[#allocation15_spill]] }
 0x2e1   : > { %s2551_s30 = sld [smem:[#allocation16_spill]]  ;;  %s2552_s12 = smov %s1866_s13 }
 0x2e2   : > { %s2553_s13 = smov %s1870_s14  ;;  %s2554_s14 = smov %s2085_s11 }
 0x2e3   : > { %s2555_s15 = smov %s1878_s16  ;;  %s2556_s16 = smov %s1882_s17 }
 0x2e4   : > { %s2557_s17 = smov %s2090_s8  ;;  %s2558_s19 = smov %s1898_s21 }
 0x2e5   :  { %19 = sbr.rel (!%p17_p13) target bundleno = 12 (0xc), region = 93 }
 0x2e7   : > { %s2559_s21 = smov %s2551_s30 }
 0x2ec   :  { %1381 = vsyncpa [#allocation4], 1 }
 0x2ed   :  { %1383 = vsyncpa [#allocation4 + $0x1], 1 }
 0x2ee   :  { %1384 = vsyncpa [#allocation7], 1 }
 0x2ef   :  { %1385 = vsyncpa [#allocation5], 1 }
 0x2f0   :  { %1387 = vsyncpa [#allocation5 + $0x1], 1 }

</bundles_post_ra>
